<compile_context>
chip_gen: v5e
topology: v5e:2x2
jax: 0.10.0
libtpu: 0.0.40
codegen_flags: <defaults>
</compile_context>

<pallas_src>
import functools
import numpy as np
import jax
import jax.numpy as jnp
from jax.experimental import pallas as pl
from jax.experimental.pallas import tpu as pltpu


# ----------------------------- Pallas kernel --------------------------------

def _moe_kernel(x_ref, plog_ref, wg_ref, w1_ref, b1_ref, w2_ref, b2_ref,
                y_ref, gates_ref, *, k, num_experts, out_dim):
    """One (batch image, token tile): gating + top-k gates + fused expert MLPs + combine.

    All blocks are token-on-lane: tokens are the last (lane) dim, features/experts sit
    on the sublane dim.
    """
    f32 = jnp.float32
    x = x_ref[0]                                                    # [C, TN]
    tn = x.shape[-1]
    E = num_experts

    # ------------- gating: logits = Wg_x^T @ x + prompt_logits[b] -------------
    logits = (jnp.dot(wg_ref[...], x, preferred_element_type=f32)
              + plog_ref[0])                                        # [E, TN]

    row = jax.lax.broadcasted_iota(jnp.int32, (E, tn), 0)
    NEG = f32(-1e30)

    # top-k selection (ties broken toward the lowest expert index, like torch.topk)
    work = logits
    selected = jnp.zeros((E, tn), dtype=jnp.bool_)
    for _ in range(k):
        m = jnp.max(work, axis=0, keepdims=True)
        is_max = work == m
        idx = jnp.min(jnp.where(is_max, row, E), axis=0, keepdims=True)
        sel = row == idx
        selected = jnp.logical_or(selected, sel)
        work = jnp.where(sel, NEG, work)

    # softmax over the selected top-k logits, scattered back to dense [E, TN]
    row_max = jnp.max(jnp.where(selected, logits, NEG), axis=0, keepdims=True)
    e_x = jnp.where(selected, jnp.exp(logits - row_max), f32(0.0))
    gates = e_x * pl.reciprocal(jnp.sum(e_x, axis=0, keepdims=True))
    gates_ref[0] = gates

    # ----- experts (fused): packed Linear -> GELU -> block-diagonal Linear -----
    h = jnp.dot(w1_ref[...], x, preferred_element_type=f32) + b1_ref[...]   # [E*Hh, TN]
    inv_sqrt2 = f32(0.7071067811865476)
    h = f32(0.5) * h * (f32(1.0) + jax.lax.erf(h * inv_sqrt2))              # exact GELU
    o_all = (jnp.dot(w2_ref[...], h, preferred_element_type=f32)
             + b2_ref[...])                                                 # [E*O, TN]

    # combine: y = log(clamp_eps(sum_e gates[e] * exp(o_e)));  guard 0*inf -> NaN
    acc = jnp.zeros((out_dim, tn), dtype=f32)
    for e in range(E):
        g_e = gates[e:e + 1, :]                                    # [1, TN]
        o_e = o_all[e * out_dim:(e + 1) * out_dim, :]              # [O, TN]
        acc = acc + jnp.where(g_e > f32(0.0), g_e * jnp.exp(o_e), f32(0.0))

    eps = f32(np.finfo(float).eps)    # matches torch reference's np.finfo(float).eps clamp
    acc = jnp.where(acc == f32(0.0), eps, acc)
    y_ref[0] = jnp.log(acc)


# ------------------------------ JAX wrapper ----------------------------------

def _cv_squared(v):
    """torch: x.float().var() (unbiased) / (x.float().mean()**2 + 1e-10)."""
    if v.shape[0] == 1:
        return jnp.zeros((), jnp.float32)
    return jnp.var(v, ddof=1) / (jnp.mean(v) ** 2 + 1e-10)


def moe_forward(x, prompt, params, *, k, tile_hw=512, use_bf16=False):
    """x: [B, C, H, W] float32, prompt: [B, C] float32. Returns (y [B,O,H,W], loss)."""
    B, C, H, W = x.shape
    HW = H * W
    w_gate, w1, b1, w2, b2 = (params["w_gate"], params["w1"], params["b1"],
                              params["w2"], params["b2"])
    E = w_gate.shape[1]
    Hh = w1.shape[2]
    O = w2.shape[2]

    # token-on-lane layout: tokens stay as the trailing (lane) axis; no NHWC transpose
    x3 = x.reshape(B, C, HW)

    # prompt is constant per image: fold its gating contribution outside the kernel
    # (avoids replicating prompt to [N, C] and streaming an [N, 2C] concat from HBM)
    wg_x = jnp.transpose(w_gate[:C, :], (1, 0))                    # [E, C]
    prompt_logits = (prompt @ w_gate[C:, :]).reshape(B, E, 1)      # [B, E, 1]

    # packed expert weights: one matmul for all experts per layer
    w1_all = jnp.transpose(w1, (0, 2, 1)).reshape(E * Hh, C)       # [E*Hh, C]
    b1_all = b1.reshape(E * Hh, 1)
    w2_t = jnp.transpose(w2, (0, 2, 1))                            # [E, O, Hh]
    eye = jnp.eye(E, dtype=w2.dtype)
    w2_bd = (w2_t[:, :, None, :] * eye[:, None, :, None]).reshape(E * O, E * Hh)
    b2_all = b2.reshape(E * O, 1)

    # pad spatial axis to a multiple of the lane tile
    tile_hw = max(128, min(tile_hw, -(-HW // 128) * 128))
    HWp = -(-HW // tile_hw) * tile_hw
    if HWp != HW:
        x3 = jnp.pad(x3, ((0, 0), (0, 0), (0, HWp - HW)))

    if use_bf16:
        # v6e/v7x option: bf16 MXU inputs (f32 accumulation); slight numeric drift vs f32.
        x3 = x3.astype(jnp.bfloat16)
        wg_x = wg_x.astype(jnp.bfloat16)
        w1_all = w1_all.astype(jnp.bfloat16)
        w2_bd = w2_bd.astype(jnp.bfloat16)

    grid = (B, HWp // tile_hw)
    kernel = functools.partial(_moe_kernel, k=k, num_experts=E, out_dim=O)

    y_pad, gates_pad = pl.pallas_call(
        kernel,
        grid=grid,
        in_specs=[
            pl.BlockSpec((1, C, tile_hw), lambda b, t: (b, 0, t)),      # x tokens
            pl.BlockSpec((1, E, 1), lambda b, t: (b, 0, 0)),            # per-image prompt logits
            pl.BlockSpec((E, C), lambda b, t: (0, 0)),                  # w_gate (x part)^T
            pl.BlockSpec((E * Hh, C), lambda b, t: (0, 0)),             # packed W1
            pl.BlockSpec((E * Hh, 1), lambda b, t: (0, 0)),             # packed b1
            pl.BlockSpec((E * O, E * Hh), lambda b, t: (0, 0)),         # block-diag W2
            pl.BlockSpec((E * O, 1), lambda b, t: (0, 0)),              # packed b2
        ],
        out_specs=[
            pl.BlockSpec((1, O, tile_hw), lambda b, t: (b, 0, t)),      # y
            pl.BlockSpec((1, E, tile_hw), lambda b, t: (b, 0, t)),      # gates
        ],
        out_shape=[
            jax.ShapeDtypeStruct((B, O, HWp), jnp.float32),
            jax.ShapeDtypeStruct((B, E, HWp), jnp.float32),
        ],
        compiler_params=pltpu.CompilerParams(
            dimension_semantics=("parallel", "parallel")),              # independent tiles
    )(x3, prompt_logits, wg_x, w1_all, b1_all, w2_bd, b2_all)

    y = y_pad[:, :, :HW].reshape(B, O, H, W)
    gates = gates_pad[:, :, :HW]                                   # [B, E, HW]

    # load-balancing loss (tiny reductions -> plain JAX glue)
    importance = jnp.sum(gates, axis=(0, 2))                       # [E]
    load = jnp.sum((gates > 0).astype(jnp.float32), axis=(0, 2))   # [E]
    loss = _cv_squared(importance) + _cv_squared(load)
    return y, loss


# ----------------------- deterministic parameter init ------------------------

def init_moe_params(key, input_size, output_size, mlp_ratio, num_experts):
    C, O = input_size, output_size
    Hh = int(input_size * mlp_ratio)
    k_gate, k_w1, k_b1, k_w2, k_b2 = jax.random.split(key, 5)
    params = {
        # torch.randn(2*input_size, num_experts)
        "w_gate": jax.random.normal(k_gate, (2 * C, num_experts), jnp.float32),
        # expert Mlp weights, stored as [E, in, out] for x @ W convention
        "w1": jax.random.normal(k_w1, (num_experts, C, Hh), jnp.float32) * 0.2,
        "b1": jax.random.normal(k_b1, (num_experts, Hh), jnp.float32) * 0.1,
        "w2": jax.random.normal(k_w2, (num_experts, Hh, O), jnp.float32) * 0.2,
        "b2": jax.random.normal(k_b2, (num_experts, O), jnp.float32) * 0.1,
    }
    return params


# ----------------------------------- main ------------------------------------

if __name__ == "__main__":
    B, C, H, W = 2, 4, 16, 16
    output_size = 4
    mlp_ratio = 2.0
    num_experts = 4
    use_experts = 2  # k

    key = jax.random.PRNGKey(0)
    k_x, k_p, k_params = jax.random.split(key, 3)
    x = jax.random.normal(k_x, (B, C, H, W), jnp.float32)
    prompt = jax.random.normal(k_p, (B, C), jnp.float32)
    params = init_moe_params(k_params, C, output_size, mlp_ratio, num_experts)

    y, loss = moe_forward(x, prompt, params, k=use_experts)
    y = jax.block_until_ready(y)
    loss = jax.block_until_ready(loss)

    assert y.shape == (B, output_size, H, W), y.shape
    assert loss.shape == ()
    assert bool(jnp.all(jnp.isfinite(y)))
    print("KERNEL_OK")
</pallas_src>

<mosaic_0001>
module attributes {stable_mosaic.version = 11 : i64} {
  func.func @_moe_kernel(%arg0: i32, %arg1: i32, %arg2: memref<1x4x256xf32, #tpu.memory_space<vmem>>, %arg3: memref<1x4x1xf32, #tpu.memory_space<vmem>>, %arg4: memref<4x4xf32, #tpu.memory_space<vmem>>, %arg5: memref<32x4xf32, #tpu.memory_space<vmem>>, %arg6: memref<32x1xf32, #tpu.memory_space<vmem>>, %arg7: memref<16x32xf32, #tpu.memory_space<vmem>>, %arg8: memref<16x1xf32, #tpu.memory_space<vmem>>, %arg9: memref<1x4x256xf32, #tpu.memory_space<vmem>>, %arg10: memref<1x4x256xf32, #tpu.memory_space<vmem>>) attributes {dimension_semantics = [#tpu.dimension_semantics<parallel>, #tpu.dimension_semantics<parallel>], iteration_bounds = array<i64: 2, 1>, scalar_prefetch = 0 : i64, scratch_operands = 0 : i64, tpu.core_type = #tpu.core_type<tc>, window_params = [{transform_indices = @transform_0, window_bounds = array<i64: 1, 4, 256>}, {transform_indices = @transform_1, window_bounds = array<i64: 1, 4, 1>}, {pipeline_mode = #tpu.pipeline_mode<synchronous>, transform_indices = @transform_2, window_bounds = array<i64: 4, 4>}, {pipeline_mode = #tpu.pipeline_mode<synchronous>, transform_indices = @transform_3, window_bounds = array<i64: 32, 4>}, {pipeline_mode = #tpu.pipeline_mode<synchronous>, transform_indices = @transform_4, window_bounds = array<i64: 32, 1>}, {pipeline_mode = #tpu.pipeline_mode<synchronous>, transform_indices = @transform_5, window_bounds = array<i64: 16, 32>}, {pipeline_mode = #tpu.pipeline_mode<synchronous>, transform_indices = @transform_6, window_bounds = array<i64: 16, 1>}, {transform_indices = @transform_7, window_bounds = array<i64: 1, 4, 256>}, {transform_indices = @transform_8, window_bounds = array<i64: 1, 4, 256>}]} {
    %c0 = arith.constant 0 : index
    %c0_0 = arith.constant 0 : index
    %c0_1 = arith.constant 0 : index
    %0 = vector.load %arg2[%c0, %c0_0, %c0_1] : memref<1x4x256xf32, #tpu.memory_space<vmem>>, vector<1x4x256xf32>
    %1 = vector.shape_cast %0 : vector<1x4x256xf32> to vector<4x256xf32>
    %c0_2 = arith.constant 0 : index
    %c0_3 = arith.constant 0 : index
    %2 = vector.load %arg4[%c0_2, %c0_3] : memref<4x4xf32, #tpu.memory_space<vmem>>, vector<4x4xf32>
    %cst = arith.constant dense<0.000000e+00> : vector<4x256xf32>
    %3 = tpu.matmul %2, %1, %cst {dimension_numbers = #tpu.dot_dimension_numbers<[1], [0], [0], [1], [0, 0, 1, 1], [], []>} : vector<4x4xf32>, vector<4x256xf32>, vector<4x256xf32> -> vector<4x256xf32>
    %c0_4 = arith.constant 0 : index
    %c0_5 = arith.constant 0 : index
    %c0_6 = arith.constant 0 : index
    %4 = vector.load %arg3[%c0_4, %c0_5, %c0_6] : memref<1x4x1xf32, #tpu.memory_space<vmem>>, vector<1x4x1xf32>
    %5 = vector.shape_cast %4 : vector<1x4x1xf32> to vector<4x1xf32>
    %6 = vector.broadcast %5 : vector<4x1xf32> to vector<4x256xf32>
    %7 = arith.addf %3, %6 : vector<4x256xf32>
    %8 = tpu.iota {dimensions = array<i32: 0>} : vector<4x256xi32>
    %false = arith.constant false
    %9 = vector.broadcast %false : i1 to vector<4x256xi1>
    %cst_7 = arith.constant dense<0xFF800000> : vector<256xf32>
    %10 = vector.multi_reduction <maximumf>, %7, %cst_7 [0] : vector<4x256xf32> to vector<256xf32>
    %11 = vector.shape_cast %10 : vector<256xf32> to vector<1x256xf32>
    %12 = vector.broadcast %11 : vector<1x256xf32> to vector<4x256xf32>
    %13 = arith.cmpf oeq, %7, %12 : vector<4x256xf32>
    %c4_i32 = arith.constant 4 : i32
    %14 = vector.broadcast %c4_i32 : i32 to vector<4x256xi32>
    %15 = arith.select %13, %8, %14 : vector<4x256xi1>, vector<4x256xi32>
    %cst_8 = arith.constant dense<2147483647> : vector<256xi32>
    %16 = vector.multi_reduction <minsi>, %15, %cst_8 [0] : vector<4x256xi32> to vector<256xi32>
    %17 = vector.shape_cast %16 : vector<256xi32> to vector<1x256xi32>
    %18 = vector.broadcast %17 : vector<1x256xi32> to vector<4x256xi32>
    %19 = arith.cmpi eq, %8, %18 : vector<4x256xi32>
    %20 = arith.ori %9, %19 : vector<4x256xi1>
    %cst_9 = arith.constant -1.000000e+30 : f32
    %21 = vector.broadcast %cst_9 : f32 to vector<4x256xf32>
    %22 = arith.select %19, %21, %7 : vector<4x256xi1>, vector<4x256xf32>
    %cst_10 = arith.constant dense<0xFF800000> : vector<256xf32>
    %23 = vector.multi_reduction <maximumf>, %22, %cst_10 [0] : vector<4x256xf32> to vector<256xf32>
    %24 = vector.shape_cast %23 : vector<256xf32> to vector<1x256xf32>
    %25 = vector.broadcast %24 : vector<1x256xf32> to vector<4x256xf32>
    %26 = arith.cmpf oeq, %22, %25 : vector<4x256xf32>
    %c4_i32_11 = arith.constant 4 : i32
    %27 = vector.broadcast %c4_i32_11 : i32 to vector<4x256xi32>
    %28 = arith.select %26, %8, %27 : vector<4x256xi1>, vector<4x256xi32>
    %cst_12 = arith.constant dense<2147483647> : vector<256xi32>
    %29 = vector.multi_reduction <minsi>, %28, %cst_12 [0] : vector<4x256xi32> to vector<256xi32>
    %30 = vector.shape_cast %29 : vector<256xi32> to vector<1x256xi32>
    %31 = vector.broadcast %30 : vector<1x256xi32> to vector<4x256xi32>
    %32 = arith.cmpi eq, %8, %31 : vector<4x256xi32>
    %33 = arith.ori %20, %32 : vector<4x256xi1>
    %cst_13 = arith.constant -1.000000e+30 : f32
    %34 = vector.broadcast %cst_13 : f32 to vector<4x256xf32>
    %35 = arith.select %33, %7, %34 : vector<4x256xi1>, vector<4x256xf32>
    %cst_14 = arith.constant dense<0xFF800000> : vector<256xf32>
    %36 = vector.multi_reduction <maximumf>, %35, %cst_14 [0] : vector<4x256xf32> to vector<256xf32>
    %37 = vector.shape_cast %36 : vector<256xf32> to vector<1x256xf32>
    %38 = vector.broadcast %37 : vector<1x256xf32> to vector<4x256xf32>
    %39 = arith.subf %7, %38 : vector<4x256xf32>
    %40 = math.exp %39 : vector<4x256xf32>
    %cst_15 = arith.constant 0.000000e+00 : f32
    %41 = vector.broadcast %cst_15 : f32 to vector<4x256xf32>
    %42 = arith.select %33, %40, %41 : vector<4x256xi1>, vector<4x256xf32>
    %cst_16 = arith.constant dense<0.000000e+00> : vector<256xf32>
    %43 = vector.multi_reduction <add>, %42, %cst_16 [0] : vector<4x256xf32> to vector<256xf32>
    %44 = vector.shape_cast %43 : vector<256xf32> to vector<1x256xf32>
    %45 = tpu.reciprocal %44 : vector<1x256xf32> -> vector<1x256xf32>
    %46 = vector.broadcast %45 : vector<1x256xf32> to vector<4x256xf32>
    %47 = arith.mulf %42, %46 : vector<4x256xf32>
    %c0_17 = arith.constant 0 : index
    %c0_18 = arith.constant 0 : index
    %c0_19 = arith.constant 0 : index
    %48 = vector.load %arg10[%c0_17, %c0_18, %c0_19] : memref<1x4x256xf32, #tpu.memory_space<vmem>>, vector<1x4x256xf32>
    %49 = vector.shape_cast %48 : vector<1x4x256xf32> to vector<4x256xf32>
    %50 = vector.shape_cast %47 : vector<4x256xf32> to vector<1x4x256xf32>
    tpu.vector_store %arg10[%c0_17, %c0_18, %c0_19], %50 {strides = array<i32>} : memref<1x4x256xf32, #tpu.memory_space<vmem>>, vector<1x4x256xf32>,
    %c0_20 = arith.constant 0 : index
    %c0_21 = arith.constant 0 : index
    %51 = vector.load %arg5[%c0_20, %c0_21] : memref<32x4xf32, #tpu.memory_space<vmem>>, vector<32x4xf32>
    %cst_22 = arith.constant dense<0.000000e+00> : vector<32x256xf32>
    %52 = tpu.matmul %51, %1, %cst_22 {dimension_numbers = #tpu.dot_dimension_numbers<[1], [0], [0], [1], [0, 0, 1, 1], [], []>} : vector<32x4xf32>, vector<4x256xf32>, vector<32x256xf32> -> vector<32x256xf32>
    %c0_23 = arith.constant 0 : index
    %c0_24 = arith.constant 0 : index
    %53 = vector.load %arg6[%c0_23, %c0_24] : memref<32x1xf32, #tpu.memory_space<vmem>>, vector<32x1xf32>
    %54 = vector.broadcast %53 : vector<32x1xf32> to vector<32x256xf32>
    %55 = arith.addf %52, %54 : vector<32x256xf32>
    %cst_25 = arith.constant 5.000000e-01 : f32
    %56 = vector.broadcast %cst_25 : f32 to vector<32x256xf32>
    %57 = arith.mulf %56, %55 : vector<32x256xf32>
    %cst_26 = arith.constant 0.707106769 : f32
    %58 = vector.broadcast %cst_26 : f32 to vector<32x256xf32>
    %59 = arith.mulf %55, %58 : vector<32x256xf32>
    %60 = math.erf %59 : vector<32x256xf32>
    %cst_27 = arith.constant 1.000000e+00 : f32
    %61 = vector.broadcast %cst_27 : f32 to vector<32x256xf32>
    %62 = arith.addf %61, %60 : vector<32x256xf32>
    %63 = arith.mulf %57, %62 : vector<32x256xf32>
    %c0_28 = arith.constant 0 : index
    %c0_29 = arith.constant 0 : index
    %64 = vector.load %arg7[%c0_28, %c0_29] : memref<16x32xf32, #tpu.memory_space<vmem>>, vector<16x32xf32>
    %cst_30 = arith.constant dense<0.000000e+00> : vector<16x256xf32>
    %65 = tpu.matmul %64, %63, %cst_30 {dimension_numbers = #tpu.dot_dimension_numbers<[1], [0], [0], [1], [0, 0, 1, 1], [], []>} : vector<16x32xf32>, vector<32x256xf32>, vector<16x256xf32> -> vector<16x256xf32>
    %c0_31 = arith.constant 0 : index
    %c0_32 = arith.constant 0 : index
    %66 = vector.load %arg8[%c0_31, %c0_32] : memref<16x1xf32, #tpu.memory_space<vmem>>, vector<16x1xf32>
    %67 = vector.broadcast %66 : vector<16x1xf32> to vector<16x256xf32>
    %68 = arith.addf %65, %67 : vector<16x256xf32>
    %cst_33 = arith.constant 0.000000e+00 : f32
    %69 = vector.broadcast %cst_33 : f32 to vector<4x256xf32>
    %70 = vector.extract_strided_slice %47 {offsets = [0, 0], sizes = [1, 256], strides = [1, 1]} : vector<4x256xf32> to vector<1x256xf32>
    %71 = vector.extract_strided_slice %68 {offsets = [0, 0], sizes = [4, 256], strides = [1, 1]} : vector<16x256xf32> to vector<4x256xf32>
    %cst_34 = arith.constant 0.000000e+00 : f32
    %72 = vector.broadcast %cst_34 : f32 to vector<1x256xf32>
    %73 = arith.cmpf ogt, %70, %72 : vector<1x256xf32>
    %74 = math.exp %71 : vector<4x256xf32>
    %75 = vector.broadcast %70 : vector<1x256xf32> to vector<4x256xf32>
    %76 = arith.mulf %75, %74 : vector<4x256xf32>
    %cst_35 = arith.constant 0.000000e+00 : f32
    %77 = vector.shape_cast %73 : vector<1x256xi1> to vector<1x256xi1>
    %78 = vector.broadcast %77 : vector<1x256xi1> to vector<4x256xi1>
    %79 = vector.broadcast %cst_35 : f32 to vector<4x256xf32>
    %80 = arith.select %78, %76, %79 : vector<4x256xi1>, vector<4x256xf32>
    %81 = arith.addf %69, %80 : vector<4x256xf32>
    %82 = vector.extract_strided_slice %47 {offsets = [1, 0], sizes = [1, 256], strides = [1, 1]} : vector<4x256xf32> to vector<1x256xf32>
    %83 = vector.extract_strided_slice %68 {offsets = [4, 0], sizes = [4, 256], strides = [1, 1]} : vector<16x256xf32> to vector<4x256xf32>
    %cst_36 = arith.constant 0.000000e+00 : f32
    %84 = vector.broadcast %cst_36 : f32 to vector<1x256xf32>
    %85 = arith.cmpf ogt, %82, %84 : vector<1x256xf32>
    %86 = math.exp %83 : vector<4x256xf32>
    %87 = vector.broadcast %82 : vector<1x256xf32> to vector<4x256xf32>
    %88 = arith.mulf %87, %86 : vector<4x256xf32>
    %cst_37 = arith.constant 0.000000e+00 : f32
    %89 = vector.shape_cast %85 : vector<1x256xi1> to vector<1x256xi1>
    %90 = vector.broadcast %89 : vector<1x256xi1> to vector<4x256xi1>
    %91 = vector.broadcast %cst_37 : f32 to vector<4x256xf32>
    %92 = arith.select %90, %88, %91 : vector<4x256xi1>, vector<4x256xf32>
    %93 = arith.addf %81, %92 : vector<4x256xf32>
    %94 = vector.extract_strided_slice %47 {offsets = [2, 0], sizes = [1, 256], strides = [1, 1]} : vector<4x256xf32> to vector<1x256xf32>
    %95 = vector.extract_strided_slice %68 {offsets = [8, 0], sizes = [4, 256], strides = [1, 1]} : vector<16x256xf32> to vector<4x256xf32>
    %cst_38 = arith.constant 0.000000e+00 : f32
    %96 = vector.broadcast %cst_38 : f32 to vector<1x256xf32>
    %97 = arith.cmpf ogt, %94, %96 : vector<1x256xf32>
    %98 = math.exp %95 : vector<4x256xf32>
    %99 = vector.broadcast %94 : vector<1x256xf32> to vector<4x256xf32>
    %100 = arith.mulf %99, %98 : vector<4x256xf32>
    %cst_39 = arith.constant 0.000000e+00 : f32
    %101 = vector.shape_cast %97 : vector<1x256xi1> to vector<1x256xi1>
    %102 = vector.broadcast %101 : vector<1x256xi1> to vector<4x256xi1>
    %103 = vector.broadcast %cst_39 : f32 to vector<4x256xf32>
    %104 = arith.select %102, %100, %103 : vector<4x256xi1>, vector<4x256xf32>
    %105 = arith.addf %93, %104 : vector<4x256xf32>
    %106 = vector.extract_strided_slice %47 {offsets = [3, 0], sizes = [1, 256], strides = [1, 1]} : vector<4x256xf32> to vector<1x256xf32>
    %107 = vector.extract_strided_slice %68 {offsets = [12, 0], sizes = [4, 256], strides = [1, 1]} : vector<16x256xf32> to vector<4x256xf32>
    %cst_40 = arith.constant 0.000000e+00 : f32
    %108 = vector.broadcast %cst_40 : f32 to vector<1x256xf32>
    %109 = arith.cmpf ogt, %106, %108 : vector<1x256xf32>
    %110 = math.exp %107 : vector<4x256xf32>
    %111 = vector.broadcast %106 : vector<1x256xf32> to vector<4x256xf32>
    %112 = arith.mulf %111, %110 : vector<4x256xf32>
    %cst_41 = arith.constant 0.000000e+00 : f32
    %113 = vector.shape_cast %109 : vector<1x256xi1> to vector<1x256xi1>
    %114 = vector.broadcast %113 : vector<1x256xi1> to vector<4x256xi1>
    %115 = vector.broadcast %cst_41 : f32 to vector<4x256xf32>
    %116 = arith.select %114, %112, %115 : vector<4x256xi1>, vector<4x256xf32>
    %117 = arith.addf %105, %116 : vector<4x256xf32>
    %cst_42 = arith.constant 0.000000e+00 : f32
    %118 = vector.broadcast %cst_42 : f32 to vector<4x256xf32>
    %119 = arith.cmpf oeq, %117, %118 : vector<4x256xf32>
    %cst_43 = arith.constant 2.22044605E-16 : f32
    %120 = vector.broadcast %cst_43 : f32 to vector<4x256xf32>
    %121 = arith.select %119, %120, %117 : vector<4x256xi1>, vector<4x256xf32>
    %122 = math.log %121 : vector<4x256xf32>
    %c0_44 = arith.constant 0 : index
    %c0_45 = arith.constant 0 : index
    %c0_46 = arith.constant 0 : index
    %123 = vector.load %arg9[%c0_44, %c0_45, %c0_46] : memref<1x4x256xf32, #tpu.memory_space<vmem>>, vector<1x4x256xf32>
    %124 = vector.shape_cast %123 : vector<1x4x256xf32> to vector<4x256xf32>
    %125 = vector.shape_cast %122 : vector<4x256xf32> to vector<1x4x256xf32>
    tpu.vector_store %arg9[%c0_44, %c0_45, %c0_46], %125 {strides = array<i32>} : memref<1x4x256xf32, #tpu.memory_space<vmem>>, vector<1x4x256xf32>,
    return
  }
  func.func @transform_0(%arg0: i32, %arg1: i32) -> (i32, i32, i32) {
    %c0_i32 = arith.constant 0 : i32
    %c0_i32_0 = arith.constant 0 : i32
    return %arg0, %c0_i32, %arg1 : i32, i32, i32
  }
  func.func @transform_1(%arg0: i32, %arg1: i32) -> (i32, i32, i32) {
    %c0_i32 = arith.constant 0 : i32
    %c0_i32_0 = arith.constant 0 : i32
    %c0_i32_1 = arith.constant 0 : i32
    return %arg0, %c0_i32, %c0_i32_0 : i32, i32, i32
  }
  func.func @transform_2(%arg0: i32, %arg1: i32) -> (i32, i32) {
    %c0_i32 = arith.constant 0 : i32
    %c0_i32_0 = arith.constant 0 : i32
    %c0_i32_1 = arith.constant 0 : i32
    return %c0_i32, %c0_i32_0 : i32, i32
  }
  func.func @transform_3(%arg0: i32, %arg1: i32) -> (i32, i32) {
    %c0_i32 = arith.constant 0 : i32
    %c0_i32_0 = arith.constant 0 : i32
    %c0_i32_1 = arith.constant 0 : i32
    return %c0_i32, %c0_i32_0 : i32, i32
  }
  func.func @transform_4(%arg0: i32, %arg1: i32) -> (i32, i32) {
    %c0_i32 = arith.constant 0 : i32
    %c0_i32_0 = arith.constant 0 : i32
    %c0_i32_1 = arith.constant 0 : i32
    return %c0_i32, %c0_i32_0 : i32, i32
  }
  func.func @transform_5(%arg0: i32, %arg1: i32) -> (i32, i32) {
    %c0_i32 = arith.constant 0 : i32
    %c0_i32_0 = arith.constant 0 : i32
    %c0_i32_1 = arith.constant 0 : i32
    return %c0_i32, %c0_i32_0 : i32, i32
  }
  func.func @transform_6(%arg0: i32, %arg1: i32) -> (i32, i32) {
    %c0_i32 = arith.constant 0 : i32
    %c0_i32_0 = arith.constant 0 : i32
    %c0_i32_1 = arith.constant 0 : i32
    return %c0_i32, %c0_i32_0 : i32, i32
  }
  func.func @transform_7(%arg0: i32, %arg1: i32) -> (i32, i32, i32) {
    %c0_i32 = arith.constant 0 : i32
    %c0_i32_0 = arith.constant 0 : i32
    return %arg0, %c0_i32, %arg1 : i32, i32, i32
  }
  func.func @transform_8(%arg0: i32, %arg1: i32) -> (i32, i32, i32) {
    %c0_i32 = arith.constant 0 : i32
    %c0_i32_0 = arith.constant 0 : i32
    return %arg0, %c0_i32, %arg1 : i32, i32, i32
  }
}

</mosaic_0001>

<bundles_post_ra>
// kernel: tpu_custom_call.1
= control target key start
LH: loop header
LB: loop body
LE: loop exit
PB: predicated region body
PF: predicated region fallthrough
CT: control target
= control target key end

     0   :  { %s2231_s0 = inlined_call_operand.vmem [shape: f32[2,4,256], index: 0, kind: input, shape index: {}]   ;;  %s2232_s1 = inlined_call_operand.vmem [shape: f32[2,4,1], index: 1, kind: input, shape index: {}]   ;;  %s2233_s2 = inlined_call_operand.vmem [shape: f32[4,4], index: 2, kind: input, shape index: {}]   ;;  %s2234_s3 = inlined_call_operand.vmem [shape: f32[32,4], index: 3, kind: input, shape index: {}]   ;;  %s2235_s4 = inlined_call_operand.vmem [shape: f32[32,1], index: 4, kind: input, shape index: {}]   ;;  %s2236_s5 = inlined_call_operand.vmem [shape: f32[16,32], index: 5, kind: input, shape index: {}]   ;;  %s2237_s6 = inlined_call_operand.vmem [shape: f32[16,1], index: 6, kind: input, shape index: {}]   ;;  %s2238_s7 = inlined_call_operand.hbm [shape: f32[2,4,256], index: 7, kind: output, shape index: {0}]   ;;  %s2239_s8 = inlined_call_operand.hbm [shape: f32[2,4,256], index: 8, kind: output, shape index: {1}]  }
   0x1   :  { %2241 = sst [smem:[#allocation8_spill]] %s2231_s0 }
   0x2   :  { %2242 = sst [smem:[#allocation9_spill]] %s2232_s1 }
   0x3   :  { %2243 = sst [smem:[#allocation10_spill]] %s2233_s2 }
   0x4   :  { %2244 = sst [smem:[#allocation11_spill]] %s2234_s3 }
   0x5   :  { %14 = vsyncpa [#allocation3], 0 }
   0x6   :  { %16 = vsyncpa [#allocation3 + $0x1], 0 }
   0x7   :  { %17 = vsyncpa [#allocation5], 0 }
   0x8   :  { %19 = vsyncpa [#allocation5 + $0x1], 0  ;;  %s1667_s27 = smov 0   ;;  %s1669_s28 = smov 0  }
   0x9   :  { %s1671_s29 = smov 0   ;;  %s1673_s30 = smov 0  }
   0xa   :  { %s1675_s9 = smov 0   ;;  %s1677_s10 = smov 0  }
   0xb LB: > { %s1362_s11 = sadd.s32 4294967295, %s1619_s10   ;;  %s1363_s12 = sadd.s32 4294967294, %s1619_s10   ;;  %s1619_s10 = sphi %s1677_s10, %s25_s10   ;;  %s1615_s9 = sphi %s1675_s9, %s2264_s9   ;;  %s1611_s30 = sphi %s1673_s30, %s2263_s30   ;;  %s1607_s29 = sphi %s1671_s29, %s2262_s29   ;;  %s1603_s28 = sphi %s1669_s28, %s2261_s28   ;;  %s1599_s27 = sphi %s1667_s27, %s2260_s27  }
   0xc   : > { %s37_s13 = sadd.s32 1, %s1615_s9  ;;  %s205_s14 = sadd.s32 1, %s1607_s29 }
   0xd   : > { %p39_p0 = scmp.ge.s32.totalorder %s37_s13, 2  ;;  %p215_p1 = scmp.ne.s32.totalorder %s1607_s29, %s1603_s28 }
   0xe   : > { %p216_p2 = scmp.eq.s32.totalorder %s1362_s11, 1  ;;  %p221_p3 = scmp.ne.s32.totalorder %s1603_s28, %s1599_s27 }
   0xf   : > { %s2266_s13 = smov (%p39_p0, %s37_s13), 0  ;;  %p222_p5 = scmp.eq.s32.totalorder %s1363_s12, 1 }
  0x10   : > { %p1707_p4 = por %p216_p2, %p215_p1  ;;  %s200_s16 = ssub.s32 %s1615_s9, %s2266_s13 }
  0x11   : > { %p1366_p6 = scmp.ge.s32.totalorder %s1619_s10, 1  ;;  %p203_p7 = scmp.eq.s32.totalorder %s200_s16, 0 }
  0x12   : > { %p1714_p8 = por %p222_p5, %p221_p3  ;;  %p303_p9 = scmp.lt.s32.totalorder %s1619_s10, 3 }
  0x13   : > { %s1720_s18 = scalar_select %p203_p7, %s1607_s29, %s205_s14  }
  0x14   : > { %p304_p10 = pnand %p1366_p6, %p303_p9 }
  0x15   : > { %p351_p11 = scmp.lt.s32.totalorder (!%p304_p10), %s1611_s30, 1  ;;  %s2247_s0 = sld [smem:[#allocation8_spill]] (!%p304_p10) }
  0x16   : > { %307 = sbr.rel (%p304_p10) target bundleno = 483 (0x1e3), region = 48  ;;  %s2248_s2 = sld [smem:[#allocation10_spill]] (!%p304_p10) }
  0x17   : > { %s2249_s1 = sld [smem:[#allocation9_spill]] (!%p304_p10) }
  0x18   : > { %s2250_s3 = sld [smem:[#allocation11_spill]] (!%p304_p10) }
  0x1b   : > { %v592_v0 = vld [vmem:[%s2235_s4 + $0x8] sm:$0xff]  ;;  %s352_s21 = scalar_select %p351_p11, %s1611_s30, 1  ;;  %v1621_v1 = vmov 0   ;;  %v591_v3 = vld [vmem:[%s2235_s4] sm:$0xff]  ;;  %v594_v4 = vld [vmem:[%s2235_s4 + $0x18] sm:$0xff]  ;;  %vm382_vm0 = vcmask 1043456   ;;  %v427_v31 = vlaneseq }
  0x1c   : > { %1471 = vset.pattern.permute.xlu1 %v1621_v1  ;;  %1470 = vset.pattern.permute.xlu0 %v1621_v1  ;;  %v367_v5 = vld [vmem:[%s2248_s2] sm:$0xf]  ;;  %vm378_vm1 = vcmask 31744   ;;  %v593_v8 = vld [vmem:[%s2235_s4 + $0x10] sm:$0xff]  ;;  %v1047_v11 = vld [vmem:[%s2237_s6 + $0x8] sm:$0xff] }
  0x1d   : > { %602 = vperm.xlu1 %1471, %v592_v0   ;;  %1472 = vset.pattern.permute.xlu2 %v1621_v1  ;;  %s1406_s22 = sshll.u32 %s352_s21, 3  ;;  %s1371_s16 = sshll.u32 %s352_s21, 2  ;;  %v1046_v18 = vld [vmem:[%s2237_s6] sm:$0xff]  ;;  %v1788_v36 = vshrl.u32 %v427_v31, 7 }
  0x1e   : > { %s358_s25 = scalar_lea.vmem %s2247_s0, %s1406_s22  ;;  %612 = vperm.xlu0 %1470, %v594_v4   ;;  %s363_s24 = scalar_lea.vmem %s2249_s1, %s1371_s16  ;;  %v587_v10 = vld [vmem:[%s2250_s3] sm:$0xff]  ;;  %v588_v14 = vld [vmem:[%s2250_s3 + $0x8] sm:$0xff]  ;;  %v589_v15 = vld [vmem:[%s2250_s3 + $0x10] sm:$0xff] }
  0x1f   : > { %v366_v2 = vld [vmem:[%s358_s25] sm:$0xff]  ;;  %v590_v16 = vld [vmem:[%s2250_s3 + $0x18] sm:$0xff]  ;;  %s2144_s16 = sand.u32 1, %s1603_s28   ;;  %s1407_s22 = sshll.u32 %s1611_s30, 3 }
  0x20   : > { %375 = vst [vmem:[#allocation1] ss:$2 sm:$0xff] %v366_v2  ;;  %v368_v9 = vld [vmem:[%s363_s24] sm:$0xf]  ;;  %s2240_s19 = sshll.u32 %s2144_s16, 3  ;;  %s1233_s21 = scalar_lea.hbm %s2239_s8, %s1407_s22 }
  0x21   : > { %371 = vperm.xlu2 %1472, %v368_v9   ;;  %s349_s20 = scalar_lea.vmem [#allocation4], %s2240_s19  ;;  %s1237_s26 = sshll.u32 %s1233_s21, 4  ;;  %s1238_s26 = int_to_ptr.hbm [resolvable:$true] %s1237_s26 }
  0x22   : > { %s1235_s25 = sshll.u32 %s349_s20, 4  ;;  %s1203_s11 = scalar_lea.sflag [#allocation5], %s2144_s16  ;;  %s1236_s25 = int_to_ptr.vmem [resolvable:$true] %s1235_s25 }
  0x23   : > { %s1523_s12 = sshra.s32 %s1238_s26, 4  ;;  %s1529_s1 = scalar_lea.hbm %s2239_s8, 16  ;;  %s1524_s12 = int_to_ptr.hbm [resolvable:$true] %s1523_s12 }
  0x24   : > { %s1525_s14 = scalar_lea.hbm %s1524_s12, 8  ;;  %p1530_p1 = scmp.lt.s32.totalorder %s1524_s12, %s2239_s8 }
  0x25   : > { %597 = vperm.xlu1 %1471, %v591_v3   ;;  %p1526_p12 = scmp.ne.s32.totalorder %s1524_s12, %s1525_s14  ;;  %p1531_p2 = scmp.lt.s32.totalorder %s1529_s1, %s1525_s14 }
  0x26   : > { %607 = vperm.xlu0 %1470, %v593_v8  }
  0x27   : > { %v376_v6 = vld.sshfl [vmem:[#allocation1] sm:$0xff pattern:$0x75316420]  ;;  %v377_v7 = vld.sshfl [vmem:[#allocation1 + $0x8] sm:$0xff pattern:$0x75316420]  ;;  %p1527_p13 = pnand %p1526_p12, %p1707_p4  ;;  %p1532_p3 = por %p1531_p2, %p1530_p1 }
  0x28   : > { %1374 = vmatpush.msk.msra.mxu1 %vm382_vm0, %v377_v7  ;;  %615 = vst [vmem:[#allocation1] ss:$2 sm:$0xff] %v366_v2  ;;  %1372 = vmatpush.msk.msra.mxu0 %vm382_vm0, %v376_v6 }
  0x29   : > { %1375 = vmatmul.msk.f32.vlgmr.msra.gmra.mxu1 %vm378_vm1, %v367_v5  ;;  %1373 = vmatmul.msk.f32.vlgmr.msra.gmra.mxu0 %vm378_vm1, %v367_v5  ;;  %p1528_p0 = pneg %p1527_p13 }
  0x2a   : > { %1050 = vperm.xlu2 %1472, %v1046_v18  }
  0x2b   : > { %p1533_p5 = pnand %p1532_p3, %p1528_p0 }
  0x2e   : > { %1055 = vperm.xlu0 %1470, %v1047_v11  }
  0x2f   : > { %v616_v12 = vld.sshfl [vmem:[#allocation1] sm:$0xff pattern:$0x75316420]  ;;  %v617_v13 = vld.sshfl [vmem:[#allocation1 + $0x8] sm:$0xff pattern:$0x75316420] }
  0x30   : > { %1376 = vmatpush.msk.msra.mxu2 %vm382_vm0, %v616_v12  ;;  %1381 = vmatpush.msk.msra.mxu3 %vm382_vm0, %v617_v13 }
  0x31   : > { %1377 = vmatmul.msk.f32.vlgmr.msra.gmra.mxu2 %vm378_vm1, %v587_v10  ;;  %1382 = vmatmul.msk.f32.vlgmr.msra.gmra.mxu3 %vm378_vm1, %v587_v10 }
  0x39   : > { %1378 = vmatmul.msk.f32.gmra.mxu2 %vm378_vm1, %v588_v14  ;;  %1383 = vmatmul.msk.f32.gmra.mxu3 %vm378_vm1, %v588_v14 }
  0x41   : > { %1379 = vmatmul.msk.f32.gmra.mxu2 %vm378_vm1, %v589_v15  ;;  %1384 = vmatmul.msk.f32.gmra.mxu3 %vm378_vm1, %v589_v15 }
  0x49   : > { %1380 = vmatmul.msk.f32.gmra.mxu2 %vm378_vm1, %v590_v16  ;;  %1385 = vmatmul.msk.f32.gmra.mxu3 %vm378_vm1, %v590_v16 }
  0x7b   : > { %v372_v17 = vpop.permute.xlu2 %371 }
  0x8f   : > { %v1792_v41 = vpop.permute.xlu1 %602 }
  0x90   : > { %v1798_v48 = vpop.permute.xlu0 %612 }
  0x97   : > { %v598_v59 = vpop.permute.xlu1 %597 }
  0x98   : > { %v608_v0 = vpop.permute.xlu0 %607 }
  0xa6   : > { %v424_v19 = vpop.f32.mrf.mxu1  ;;  %v404_v20 = vpop.f32.mrf.mxu0 }
  0xa7   : > { %v1780_v21 = vadd.f32 %v424_v19, %v372_v17  ;;  %v1782_v22 = vadd.f32 %v404_v20, %v372_v17 }
  0xa9   : > { %v436_v23 = vsel %vm382_vm0, %v1780_v21, -inf  ;;  %v429_v24 = vsel %vm382_vm0, %v1782_v22, -inf }
  0xaa   : > { %v437_v25 = vrot.slane %v436_v23, 4  ;;  %v430_v26 = vrot.slane %v429_v24, 4 }
  0xac   : > { %v438_v27 = vmax.f32 %v436_v23, %v437_v25  ;;  %v431_v28 = vmax.f32 %v429_v24, %v430_v26 }
  0xae   : > { %v439_v29 = vrot.slane %v438_v27, 2  ;;  %v432_v30 = vrot.slane %v431_v28, 2 }
  0xb0   : > { %v440_v32 = vmax.f32 %v438_v27, %v439_v29  ;;  %v433_v33 = vmax.f32 %v431_v28, %v432_v30 }
  0xb2   : > { %v441_v34 = vrot.slane %v440_v32, 1  ;;  %v434_v35 = vrot.slane %v433_v33, 1 }
  0xb4   : > { %v442_v37 = vmax.f32 %v440_v32, %v441_v34  ;;  %v435_v38 = vmax.f32 %v433_v33, %v434_v35  ;;  %v651_v39 = vpop.f32.mrf.mxu2  ;;  %v680_v40 = vpop.f32.mrf.mxu3 }
  0xb5   : > { %v1806_v62 = vadd.f32 %v651_v39, %v598_v59  ;;  %v1830_v14 = vadd.f32 %v680_v40, %v598_v59 }
  0xb6   : > { %vm444_vm2 = vcmp.eq.f32.partialorder %v1780_v21, %v442_v37  ;;  %vm443_vm3 = vcmp.eq.f32.partialorder %v1782_v22, %v435_v38 }
  0xb7   : > { %v446_v42 = vsel %vm444_vm2, %v1788_v36, 4  ;;  %v445_v43 = vsel %vm443_vm3, %v1788_v36, 4  ;;  %v1825_v9 = vmul.f32 0.70710677, %v1806_v62  ;;  %v1839_v24 = vmul.f32 0.70710677, %v1830_v14 }
  0xb8   : > { %v457_v44 = vsel %vm382_vm0, %v446_v42, 2147483647  ;;  %v447_v45 = vsel %vm382_vm0, %v445_v43, 2147483647 }
  0xb9   : > { %v458_v46 = vrot.slane %v457_v44, 4  ;;  %v448_v47 = vrot.slane %v447_v45, 4  ;;  %v708_v18 = vmul.f32 %v1825_v9, %v1825_v9  ;;  %v748_v33 = vmul.f32 %v1839_v24, %v1839_v24 }
  0xbb   : > { %vm459_vm4 = vcmp.lt.s32.totalorder %v457_v44, %v458_v46  ;;  %vm449_vm5 = vcmp.lt.s32.totalorder %v447_v45, %v448_v47  ;;  %v1847_v29 = vmin.f32 %v708_v18, 16.0 }
  0xbc   : > { %v460_v49 = vsel %vm459_vm4, %v457_v44, %v458_v46  ;;  %v450_v50 = vsel %vm449_vm5, %v447_v45, %v448_v47  ;;  %v654_v51 = vpop.f32.mrf.mxu2  ;;  %v1800_v54 = vpop.f32.mrf.mxu3  ;;  %v1864_v45 = vmin.f32 %v748_v33, 16.0 }
  0xbd   : > { %v461_v52 = vrot.slane %v460_v49, 2  ;;  %v451_v53 = vrot.slane %v450_v50, 2  ;;  %v1842_v25 = vadd.f32 %v654_v51, %v1792_v41  ;;  %v710_v37 = vmul.f32 2.1237322e-06, %v1847_v29 }
  0xbe   : > { %v750_v59 = vmul.f32 2.1237322e-06, %v1864_v45 }
  0xbf   : > { %vm462_vm6 = vcmp.lt.s32.totalorder %v460_v49, %v461_v52  ;;  %vm452_vm7 = vcmp.lt.s32.totalorder %v450_v50, %v451_v53  ;;  %v1854_v34 = vmul.f32 0.70710677, %v1842_v25  ;;  %v711_v51 = vadd.f32 0.00028619796, %v710_v37 }
  0xc0   : > { %v463_v55 = vsel %vm462_vm6, %v460_v49, %v461_v52  ;;  %v453_v56 = vsel %vm452_vm7, %v450_v50, %v451_v53  ;;  %v1872_v52 = vadd.f32 %v1800_v54, %v1792_v41 }
  0xc1   : > { %v464_v57 = vrot.slane %v463_v55, 1  ;;  %v454_v58 = vrot.slane %v453_v56, 1  ;;  %v788_v49 = vmul.f32 %v1854_v34, %v1854_v34  ;;  %v712_v41 = vmul.f32 %v711_v51, %v1847_v29 }
  0xc2   : > { %v1883_v54 = vmul.f32 0.70710677, %v1872_v52 }
  0xc3   : > { %vm465_vm8 = vcmp.lt.s32.totalorder %v463_v55, %v464_v57  ;;  %vm455_vm9 = vcmp.lt.s32.totalorder %v453_v56, %v454_v58 }
  0xc4   : > { %v1802_v60 = vsel %vm465_vm8, %v463_v55, %v464_v57  ;;  %v1804_v61 = vsel %vm455_vm9, %v453_v56, %v454_v58  ;;  %v657_v63 = vpop.f32.mrf.mxu2  ;;  %v686_v10 = vpop.f32.mrf.mxu3 }
  0xc5   : > { %vm468_vm10 = vcmp.eq.s32.totalorder %v1788_v36, %v1802_v60  ;;  %vm467_vm11 = vcmp.eq.s32.totalorder %v1788_v36, %v1804_v61  ;;  %v1820_v4 = vadd.f32 %v657_v63, %v608_v0  ;;  %v1832_v15 = vadd.f32 %v686_v10, %v608_v0 }
  0xc6   : > { %v470_v2 = vsel %vm468_vm10, -1e+30, %v1780_v21  ;;  %v469_v3 = vsel %vm467_vm11, -1e+30, %v1782_v22 }
  0xc7   : > { %v478_v5 = vsel %vm382_vm0, %v470_v2, -inf  ;;  %v471_v6 = vsel %vm382_vm0, %v469_v3, -inf  ;;  %v1828_v11 = vmul.f32 0.70710677, %v1820_v4  ;;  %v1845_v26 = vmul.f32 0.70710677, %v1832_v15 }
  0xc8   : > { %v479_v7 = vrot.slane %v478_v5, 4  ;;  %v472_v8 = vrot.slane %v471_v6, 4 }
  0xc9   : > { %v868_v19 = vmul.f32 %v1828_v11, %v1828_v11  ;;  %v908_v35 = vmul.f32 %v1845_v26, %v1845_v26 }
  0xca   : > { %v480_v12 = vmax.f32 %v478_v5, %v479_v7  ;;  %v473_v13 = vmax.f32 %v471_v6, %v472_v8 }
  0xcb   : > { %v1849_v30 = vmin.f32 %v868_v19, 16.0  ;;  %v1868_v50 = vmin.f32 %v908_v35, 16.0 }
  0xcc   : > { %v481_v16 = vrot.slane %v480_v12, 2  ;;  %v474_v17 = vrot.slane %v473_v13, 2  ;;  %v660_v42 = vpop.f32.mrf.mxu2  ;;  %v689_v56 = vpop.f32.mrf.mxu3 }
  0xcd   : > { %v870_v40 = vmul.f32 2.1237322e-06, %v1849_v30  ;;  %v1875_v53 = vadd.f32 %v660_v42, %v1798_v48  ;;  %v1889_v6 = vadd.f32 %v689_v56, %v1798_v48  ;;  %v828_v48 = vmul.f32 %v1883_v54, %v1883_v54 }
  0xce   : > { %v482_v20 = vmax.f32 %v480_v12, %v481_v16  ;;  %v475_v23 = vmax.f32 %v473_v13, %v474_v17  ;;  %v751_v12 = vadd.f32 0.00028619796, %v750_v59 }
  0xcf   : > { %v871_v55 = vadd.f32 0.00028619796, %v870_v40  ;;  %v1886_v5 = vmul.f32 0.70710677, %v1875_v53  ;;  %v1931_v60 = vmin.f32 %v828_v48, 16.0 }
  0xd0   : > { %v483_v27 = vrot.slane %v482_v20, 1  ;;  %v476_v28 = vrot.slane %v475_v23, 1 }
  0xd1   : > { %v872_v7 = vmul.f32 %v871_v55, %v1849_v30  ;;  %v948_v13 = vmul.f32 %v1886_v5, %v1886_v5 }
  0xd2   : > { %v484_v31 = vmax.f32 %v482_v20, %v483_v27  ;;  %v477_v32 = vmax.f32 %v475_v23, %v476_v28  ;;  %v1895_v20 = vadd.f32 0.0036580483, %v712_v41  ;;  %v1902_v27 = vmul.f32 0.70710677, %v1889_v6 }
  0xd3   : > { %v1899_v23 = vmin.f32 %v948_v13, 16.0  ;;  %v873_v28 = vadd.f32 0.0036580483, %v872_v7 }
  0xd4   : > { %vm486_vm12 = vcmp.eq.f32.partialorder %v470_v2, %v484_v31  ;;  %vm485_vm13 = vcmp.eq.f32.partialorder %v469_v3, %v477_v32  ;;  %v1878_v2 = vmin.f32 %v788_v49, 16.0  ;;  %v910_v3 = vmul.f32 2.1237322e-06, %v1868_v50 }
  0xd5   : > { %v488_v38 = vsel %vm486_vm12, %v1788_v36, 4  ;;  %v487_v39 = vsel %vm485_vm13, %v1788_v36, 4  ;;  %v881_v31 = vmul.f32 3.8918573e-05, %v1849_v30  ;;  %v950_v35 = vmul.f32 2.1237322e-06, %v1899_v23 }
  0xd6   : > { %v499_v43 = vsel %vm382_vm0, %v488_v38, 2147483647  ;;  %v489_v44 = vsel %vm382_vm0, %v487_v39, 2147483647  ;;  %v790_v18 = vmul.f32 2.1237322e-06, %v1878_v2  ;;  %v988_v37 = vmul.f32 %v1902_v27, %v1902_v27 }
  0xd7   : > { %v500_v46 = vrot.slane %v499_v43, 4  ;;  %v490_v47 = vrot.slane %v489_v44, 4  ;;  %v911_v19 = vadd.f32 0.00028619796, %v910_v3  ;;  %v951_v42 = vadd.f32 0.00028619796, %v950_v35 }
  0xd8   : > { %v791_v38 = vadd.f32 0.00028619796, %v790_v18  ;;  %v874_v49 = vmul.f32 %v873_v28, %v1849_v30  ;;  %v882_v51 = vadd.f32 0.001143296, %v881_v31 }
  0xd9   : > { %vm501_vm14 = vcmp.lt.s32.totalorder %v499_v43, %v500_v46  ;;  %vm491_vm15 = vcmp.lt.s32.totalorder %v489_v44, %v490_v47  ;;  %v912_v39 = vmul.f32 %v911_v19, %v1868_v50 }
  0xda   : > { %v502_v57 = vsel %vm501_vm14, %v499_v43, %v500_v46  ;;  %v492_v58 = vsel %vm491_vm15, %v489_v44, %v490_v47  ;;  %v1918_v43 = vmin.f32 %v988_v37, 16.0  ;;  %v961_v44 = vmul.f32 3.8918573e-05, %v1899_v23 }
  0xdb   : > { %v503_v63 = vrot.slane %v502_v57, 2  ;;  %v493_v0 = vrot.slane %v492_v58, 2  ;;  %v913_v59 = vadd.f32 0.0036580483, %v912_v39  ;;  %v883_v7 = vmul.f32 %v882_v51, %v1849_v30 }
  0xdc   : > { %v1001_v13 = vmul.f32 3.8918573e-05, %v1918_v43  ;;  %v875_v28 = vadd.f32 0.05243302, %v874_v49 }
  0xdd   : > { %vm504_vm1 = vcmp.lt.s32.totalorder %v502_v57, %v503_v63  ;;  %vm494_vm2 = vcmp.lt.s32.totalorder %v492_v58, %v493_v0  ;;  %v884_v48 = vadd.f32 0.014752088, %v883_v7  ;;  %v914_v35 = vmul.f32 %v913_v59, %v1868_v50 }
  0xde   : > { %v505_v8 = vsel %vm504_vm1, %v502_v57, %v503_v63  ;;  %v495_v10 = vsel %vm494_vm2, %v492_v58, %v493_v0  ;;  %v952_v57 = vmul.f32 %v951_v42, %v1899_v23  ;;  %v990_v58 = vmul.f32 2.1237322e-06, %v1918_v43 }
  0xdf   : > { %v506_v16 = vrot.slane %v505_v8, 1  ;;  %v496_v17 = vrot.slane %v495_v10, 1  ;;  %v962_v63 = vadd.f32 0.001143296, %v961_v44  ;;  %v885_v39 = vmul.f32 %v884_v48, %v1849_v30 }
  0xe0   : > { %v953_v3 = vadd.f32 0.0036580483, %v952_v57  ;;  %v991_v41 = vadd.f32 0.00028619796, %v990_v58 }
  0xe1   : > { %vm507_vm3 = vcmp.lt.s32.totalorder %v505_v8, %v506_v16  ;;  %vm497_vm4 = vcmp.lt.s32.totalorder %v495_v10, %v496_v17  ;;  %v886_v58 = vadd.f32 0.112945676, %v885_v39 }
  0xe2   : > { %v508_v32 = vsel %vm507_vm3, %v505_v8, %v506_v16  ;;  %v498_v33 = vsel %vm497_vm4, %v495_v10, %v496_v17  ;;  %v963_v10 = vmul.f32 %v962_v63, %v1899_v23  ;;  %v921_v16 = vmul.f32 3.8918573e-05, %v1868_v50 }
  0xe3   : > { %vm510_vm5 = vcmp.eq.s32.totalorder %v1788_v36, %v508_v32  ;;  %vm509_vm6 = vcmp.eq.s32.totalorder %v1788_v36, %v498_v33  ;;  %v830_v17 = vmul.f32 2.1237322e-06, %v1931_v60  ;;  %v954_v18 = vmul.f32 %v953_v3, %v1899_v23 }
  0xe4   : > { %vm1914_vm7 = vmor %vm468_vm10, %vm510_vm5  ;;  %v992_v19 = vmul.f32 %v991_v41, %v1918_v43  ;;  %v964_v31 = vadd.f32 0.014752088, %v963_v10  ;;  %v1002_v32 = vadd.f32 0.001143296, %v1001_v13  ;;  %v922_v51 = vadd.f32 0.001143296, %v921_v16 }
  0xe5   : > { %v514_v46 = vsel %vm1914_vm7, %v1780_v21, -1e+30  ;;  %vm1927_vm8 = vmor %vm467_vm11, %vm509_vm6  ;;  %v955_v57 = vadd.f32 0.05243302, %v954_v18  ;;  %v915_v3 = vadd.f32 0.05243302, %v914_v35  ;;  %v887_v41 = vmul.f32 %v886_v58, %v1849_v30 }
  0xe6   : > { %v522_v55 = vsel %vm382_vm0, %v514_v46, -inf  ;;  %v513_v56 = vsel %vm1927_vm8, %v1782_v22, -1e+30  ;;  %v993_v37 = vadd.f32 0.0036580483, %v992_v19  ;;  %v965_v44 = vmul.f32 %v964_v31, %v1899_v23 }
  0xe7   : > { %v523_v36 = vrot.slane %v522_v55, 4  ;;  %v515_v61 = vsel %vm382_vm0, %v513_v56, -inf  ;;  %v1003_v46 = vmul.f32 %v1002_v32, %v1918_v43  ;;  %v831_v56 = vadd.f32 0.00028619796, %v830_v17 }
  0xe8   : > { %v516_v0 = vrot.slane %v515_v61, 4  ;;  %v994_v49 = vmul.f32 %v993_v37, %v1918_v43  ;;  %v923_v59 = vmul.f32 %v922_v51, %v1868_v50  ;;  %v792_v16 = vmul.f32 %v791_v38, %v1878_v2 }
  0xe9   : > { %v524_v8 = vmax.f32 %v522_v55, %v523_v36  ;;  %v752_v55 = vmul.f32 %v751_v12, %v1864_v45  ;;  %v966_v36 = vadd.f32 0.112945676, %v965_v44  ;;  %v832_v17 = vmul.f32 %v831_v56, %v1931_v60 }
  0xea   : > { %v517_v33 = vmax.f32 %v515_v61, %v516_v0  ;;  %v1004_v61 = vadd.f32 0.014752088, %v1003_v46  ;;  %v876_v0 = vmul.f32 %v875_v28, %v1849_v30  ;;  %v924_v13 = vadd.f32 0.014752088, %v923_v59 }
  0xeb   : > { %v525_v42 = vrot.slane %v524_v8, 2  ;;  %v967_v10 = vmul.f32 %v966_v36, %v1899_v23  ;;  %v956_v18 = vmul.f32 %v955_v57, %v1899_v23  ;;  %v888_v19 = vadd.f32 0.4994258, %v887_v41 }
  0xec   : > { %v518_v63 = vrot.slane %v517_v33, 2  ;;  %v1005_v12 = vmul.f32 %v1004_v61, %v1918_v43  ;;  %v995_v48 = vadd.f32 0.05243302, %v994_v49  ;;  %v925_v28 = vmul.f32 %v924_v13, %v1868_v50 }
  0xed   : > { %v526_v7 = vmax.f32 %v524_v8, %v525_v42  ;;  %v968_v31 = vadd.f32 0.4994258, %v967_v10  ;;  %v877_v37 = vadd.f32 0.18741608, %v876_v0  ;;  %v916_v8 = vmul.f32 %v915_v3, %v1868_v50 }
  0xee   : > { %v1006_v32 = vadd.f32 0.112945676, %v1005_v12  ;;  %v519_v35 = vmax.f32 %v517_v33, %v518_v63  ;;  %v889_v39 = vmul.f32 %v888_v19, %v1849_v30  ;;  %v926_v46 = vadd.f32 0.112945676, %v925_v28 }
  0xef   : > { %v527_v42 = vrot.slane %v526_v7, 1  ;;  %v969_v44 = vmul.f32 %v968_v31, %v1899_v23  ;;  %v714_v51 = vmul.f32 %v1895_v20, %v1847_v29  ;;  %v793_v56 = vadd.f32 0.0036580483, %v792_v16 }
  0xf0   : > { %v1007_v38 = vmul.f32 %v1006_v32, %v1918_v43  ;;  %v957_v57 = vadd.f32 0.18741608, %v956_v18  ;;  %v1969_v58 = vadd.f32 1.0, %v889_v39  ;;  %v996_v33 = vmul.f32 %v995_v48, %v1918_v43 }
  0xf1   : > { %v1972_v49 = vadd.f32 1.0, %v969_v44  ;;  %v927_v61 = vmul.f32 %v926_v46, %v1868_v50  ;;  %v753_v59 = vadd.f32 0.0036580483, %v752_v55  ;;  %v833_v63 = vadd.f32 0.0036580483, %v832_v17 }
  0xf2   : > { %v1008_v36 = vadd.f32 0.4994258, %v1007_v38  ;;  %v878_v0 = vmul.f32 %v877_v37, %v1849_v30  ;;  %v528_v3 = vmax.f32 %v526_v7, %v527_v42  ;;  %v520_v41 = vrot.slane %v519_v35, 1 }
  0xf3   : > { %v917_v10 = vadd.f32 0.18741608, %v916_v8  ;;  %1473 = vrcp.f32 %v1972_v49  ;;  %v715_v20 = vadd.f32 0.05243302, %v714_v51  ;;  %v958_v12 = vmul.f32 %v957_v57, %v1899_v23 }
  0xf4   : > { %v1009_v13 = vmul.f32 %v1008_v36, %v1918_v43  ;;  %1475 = vrcp.f32 %v1969_v58  ;;  %v794_v16 = vmul.f32 %v793_v56, %v1878_v2  ;;  %v997_v18 = vadd.f32 0.18741608, %v996_v33 }
  0xf5   : > { %v928_v19 = vadd.f32 0.4994258, %v927_v61  ;;  %v834_v55 = vmul.f32 %v833_v63, %v1931_v60  ;;  %v879_v17 = vadd.f32 1.1283791, %v878_v0  ;;  %v530_v7 = vsub.f32 %v1780_v21, %v528_v3 }
  0xf6   : > { %v1982_v30 = vadd.f32 1.0, %v1009_v13  ;;  %v521_v48 = vmax.f32 %v519_v35, %v520_v41  ;;  %v918_v31 = vmul.f32 %v917_v10, %v1868_v50  ;;  %v1988_v32 = vmul.f32 %v715_v20, %v1847_v29 }
  0xf7   : > { %v929_v23 = vmul.f32 %v928_v19, %v1868_v50  ;;  %v1991_v28 = vmul.f32 %v753_v59, %v1864_v45  ;;  %v959_v37 = vadd.f32 1.1283791, %v958_v12  ;;  %v1994_v39 = vadd.f32 0.05243302, %v794_v16 }
  0xf8   : > { %1477 = vrcp.f32 %v1982_v30  ;;  %v1997_v42 = vmul.f32 0.5, %v1820_v4  ;;  %v998_v21 = vmul.f32 %v997_v18, %v1918_v43  ;;  %v2002_v44 = vadd.f32 0.05243302, %v834_v55 }
  0xf9   : > { %v1474_v8 = vpop.eup %1473  ;;  %v2000_v35 = vadd.f32 1.0, %v929_v23  ;;  %v880_v38 = vmul.f32 %v879_v17, %v1828_v11  ;;  %v2006_v46 = vmul.f32 0.5, %v1875_v53  ;;  %v533_v56 = vmul.f32 1.442695, %v530_v7 }
  0xfa   : > { %v1476_v50 = vpop.eup %1475  ;;  %v972_v51 = vmul.f32 %v1474_v8, %v1972_v49  ;;  %v529_v57 = vsub.f32 %v1782_v22, %v521_v48  ;;  %v2010_v33 = vadd.f32 1.1283791, %v918_v31  ;;  %v960_v43 = vmul.f32 %v959_v37, %v1886_v5 }
  0xfb   : > { %v892_v4 = vmul.f32 %v1476_v50, %v1969_v58  ;;  %v980_v61 = vand.u32 2147483647, %v1972_v49  ;;  %v900_v59 = vand.u32 2147483647, %v1969_v58  ;;  %v999_v11 = vadd.f32 1.1283791, %v998_v21 }
  0xfc   : > { %v973_v36 = vsub.f32 1.0, %v972_v51  ;;  %v982_v53 = vand.u32 2147483648, %v1972_v49  ;;  %1479 = vrcp.f32 %v2000_v35  ;;  %vm977_vm9 = vweird.f32 %v1474_v8 }
  0xfd   : > { %v893_v63 = vsub.f32 1.0, %v892_v4  ;;  %v902_v22 = vand.u32 2147483648, %v1969_v58  ;;  %v801_v41 = vmul.f32 3.8918573e-05, %v1878_v2  ;;  %vm896_vm10 = vweird.f32 %v1969_v58 }
  0xfe   : > { %v1478_v0 = vpop.eup %1477  ;;  %v974_v3 = vmul.f32 %v1474_v8, %v973_v36  ;;  %vm897_vm11 = vweird.f32 %v1476_v50  ;;  %vm976_vm12 = vweird.f32 %v1972_v49  ;;  %vm981_vm13 = vcmp.eq.f32.partialorder %v980_v61, 8.507059e+37 }
  0xff   : > { %v1012_v5 = vmul.f32 %v1478_v0, %v1982_v30  ;;  %v894_v10 = vmul.f32 %v1476_v50, %v893_v63  ;;  %vm2023_vm14 = vcmp.eq.f32.partialorder %v900_v59, 8.507059e+37  ;;  %vm978_vm15 = vmor %vm976_vm12, %vm977_vm9  ;;  %v983_v13 = vor.u32 1.1754944e-38, %v982_v53 }
 0x100   : > { %v975_v20 = vadd.f32 %v1474_v8, %v974_v3  ;;  %v841_v19 = vmul.f32 3.8918573e-05, %v1931_v60  ;;  %vm898_vm1 = vmor %vm896_vm10, %vm897_vm11  ;;  %v903_v17 = vor.u32 1.1754944e-38, %v902_v22  ;;  %v802_v7 = vadd.f32 0.001143296, %v801_v41 }
 0x101   : > { %v1013_v16 = vsub.f32 1.0, %v1012_v5  ;;  %v895_v18 = vadd.f32 %v1476_v50, %v894_v10  ;;  %v721_v58 = vmul.f32 3.8918573e-05, %v1847_v29  ;;  %v1022_v23 = vand.u32 2147483648, %v1982_v30 }
 0x102   : > { %v979_v55 = vsel %vm978_vm15, %v1474_v8, %v975_v20  ;;  %v2029_v48 = vpop.eup %1479  ;;  %vm1017_vm2 = vweird.f32 %v1478_v0  ;;  %v1020_v51 = vand.u32 2147483647, %v1982_v30  ;;  %1481 = vpow2.f32 %v533_v56 }
 0x103   : > { %v984_v49 = vsel %vm981_vm13, %v983_v13, %v979_v55  ;;  %v1014_v31 = vmul.f32 %v1478_v0, %v1013_v16  ;;  %v899_v37 = vsel %vm898_vm1, %v1476_v50, %v895_v18  ;;  %v531_v8 = vmul.f32 1.442695, %v529_v57 }
 0x104   : > { %v985_v21 = vmul.f32 %v984_v49, %v960_v43  ;;  %v904_v4 = vsel %vm2023_vm14, %v903_v17, %v899_v37  ;;  %vm1016_vm3 = vweird.f32 %v1982_v30  ;;  %v932_v59 = vmul.f32 %v2029_v48, %v2000_v35 }
 0x105   : > { %v1015_v36 = vadd.f32 %v1478_v0, %v1014_v31  ;;  %v905_v61 = vmul.f32 %v904_v4, %v880_v38  ;;  %v803_v53 = vmul.f32 %v802_v7, %v1878_v2  ;;  %v761_v50 = vmul.f32 3.8918573e-05, %v1864_v45  ;;  %vm1018_vm4 = vmor %vm1016_vm3, %vm1017_vm2 }
 0x106   : > { %v1000_v43 = vmul.f32 %v999_v11, %v1902_v27  ;;  %v1023_v63 = vor.u32 1.1754944e-38, %v1022_v23  ;;  %v842_v3 = vadd.f32 0.001143296, %v841_v19  ;;  %v722_v22 = vadd.f32 0.001143296, %v721_v58 }
 0x107   : > { %v1392_v41 = vclamps-f32 %v985_v21, 1.0  ;;  %v1019_v56 = vsel %vm1018_vm4, %v1478_v0, %v1015_v36  ;;  %vm1021_vm5 = vcmp.eq.f32.partialorder %v1020_v51, 8.507059e+37  ;;  %v940_v38 = vand.u32 2147483647, %v2000_v35 }
 0x108   : > { %v1024_v57 = vsel %vm1021_vm5, %v1023_v63, %v1019_v56  ;;  %v1390_v30 = vclamps-f32 %v905_v61, 1.0  ;;  %vm937_vm6 = vweird.f32 %v2029_v48  ;;  %v942_v5 = vand.u32 2147483648, %v2000_v35  ;;  %v1482_v27 = vpop.eup %1481 }
 0x109   : > { %v1034_v10 = vadd.f32 1.0, %v1392_v41  ;;  %v1025_v20 = vmul.f32 %v1024_v57, %v1000_v43  ;;  %v933_v12 = vsub.f32 1.0, %v932_v59  ;;  %v804_v13 = vadd.f32 0.014752088, %v803_v53 }
 0x10a   : > { %v1032_v11 = vadd.f32 1.0, %v1390_v30  ;;  %v843_v16 = vmul.f32 %v842_v3, %v1931_v60  ;;  %v723_v18 = vmul.f32 %v722_v22, %v1847_v29  ;;  %v762_v0 = vadd.f32 0.001143296, %v761_v50 }
 0x10b   : > { %v1042_v19 = vmul.f32 %v1034_v10, %v2006_v46  ;;  %v1393_v55 = vclamps-f32 %v1025_v20, 1.0  ;;  %v934_v17 = vmul.f32 %v2029_v48, %v933_v12  ;;  %v805_v7 = vmul.f32 %v804_v13, %v1878_v2 }
 0x10c   : > { %1483 = vpow2.f32 %v531_v8  ;;  %v920_v58 = vmul.f32 %v2010_v33, %v1845_v26  ;;  %v699_v49 = vmul.f32 0.5, %v1889_v6  ;;  %v844_v31 = vadd.f32 0.014752088, %v843_v16 }
 0x10d   : > { %1077 = vmatpush.msrb.mxu0 %v1042_v19  ;;  %v1035_v23 = vadd.f32 1.0, %v1393_v55  ;;  %v1040_v37 = vmul.f32 %v1032_v11, %v1997_v42  ;;  %v935_v21 = vadd.f32 %v2029_v48, %v934_v17  ;;  %vm936_vm9 = vweird.f32 %v2000_v35 }
 0x10e   : > { %vm938_vm10 = vmor %vm936_vm9, %vm937_vm6  ;;  %v943_v46 = vor.u32 1.1754944e-38, %v942_v5  ;;  %v806_v51 = vadd.f32 0.112945676, %v805_v7  ;;  %v845_v4 = vmul.f32 %v844_v31, %v1931_v60  ;;  %v724_v8 = vadd.f32 0.014752088, %v723_v18 }
 0x10f   : > { %v1043_v26 = vmul.f32 %v1035_v23, %v699_v49  ;;  %1078 = vmatpush.msrb.mxu0 %v1040_v37  ;;  %v939_v6 = vsel %vm938_vm10, %v2029_v48, %v935_v21  ;;  %vm941_vm11 = vcmp.eq.f32.partialorder %v940_v38, 8.507059e+37  ;;  %v763_v33 = vmul.f32 %v762_v0, %v1864_v45 }
 0x110   : > { %v755_v42 = vadd.f32 0.05243302, %v1991_v28  ;;  %v944_v36 = vsel %vm941_vm11, %v943_v46, %v939_v6  ;;  %v807_v35 = vmul.f32 %v806_v51, %v1878_v2  ;;  %v846_v61 = vadd.f32 0.112945676, %v845_v4 }
 0x111   : > { %1100 = vmatpush.msrb.mxu1 %v1043_v26  ;;  %v945_v59 = vmul.f32 %v944_v36, %v920_v58  ;;  %v725_v53 = vmul.f32 %v724_v8, %v1847_v29  ;;  %v764_v50 = vadd.f32 0.014752088, %v763_v33  ;;  %v796_v63 = vmul.f32 %v1994_v39, %v1878_v2 }
 0x112   : > { %v1484_v43 = vpop.eup %1483  ;;  %v808_v3 = vadd.f32 0.4994258, %v807_v35  ;;  %v847_v48 = vmul.f32 %v846_v61, %v1931_v60  ;;  %v836_v22 = vmul.f32 %v2002_v44, %v1931_v60  ;;  %v717_v38 = vadd.f32 0.18741608, %v1988_v32 }
 0x113   : > { %v1391_v28 = vclamps-f32 %v945_v59, 1.0  ;;  %v726_v41 = vadd.f32 0.112945676, %v725_v53  ;;  %v765_v56 = vmul.f32 %v764_v50, %v1864_v45  ;;  %v756_v57 = vmul.f32 %v755_v42, %v1864_v45 }
 0x114   : > { %v809_v30 = vmul.f32 %v808_v3, %v1878_v2  ;;  %v848_v5 = vadd.f32 0.4994258, %v847_v48  ;;  %v2074_v39 = vsel %vm1914_vm7, %v1482_v27, 0.0  ;;  %v697_v10 = vmul.f32 0.5, %v1832_v15 }
 0x115   : > { %v1033_v20 = vadd.f32 1.0, %v1391_v28  ;;  %v727_v44 = vmul.f32 %v726_v41, %v1847_v29  ;;  %v2080_v12 = vsel %vm1927_vm8, %v1484_v43, 0.0  ;;  %v797_v13 = vadd.f32 0.18741608, %v796_v63 }
 0x116   : > { %v810_v32 = vadd.f32 1.0, %v809_v30  ;;  %v849_v11 = vmul.f32 %v848_v5, %v1931_v60  ;;  %v837_v16 = vadd.f32 0.18741608, %v836_v22  ;;  %v766_v19 = vadd.f32 0.112945676, %v765_v56 }
 0x117   : > { %v1041_v18 = vmul.f32 %v1033_v20, %v697_v10  ;;  %v728_v0 = vadd.f32 0.4994258, %v727_v44  ;;  %v544_v40 = vsel %vm382_vm0, %v2074_v39, 0.0  ;;  %v718_v15 = vmul.f32 %v717_v38, %v1847_v29 }
 0x118   : > { %1485 = vrcp.f32 %v810_v32  ;;  %v537_v27 = vsel %vm382_vm0, %v2080_v12, 0.0  ;;  %v2088_v47 = vadd.f32 1.0, %v849_v11  ;;  %v767_v17 = vmul.f32 %v766_v19, %v1864_v45 }
 0x119   : > { %1101 = vmatpush.msrb.mxu1 %v1041_v18  ;;  %v729_v55 = vmul.f32 %v728_v0, %v1847_v29  ;;  %v757_v7 = vadd.f32 0.18741608, %v756_v57  ;;  %v798_v58 = vmul.f32 %v797_v13, %v1878_v2  ;;  %v838_v49 = vmul.f32 %v837_v16, %v1931_v60 }
 0x11a   : > { %1487 = vrcp.f32 %v2088_v47  ;;  %v545_v31 = vrot.slane %v544_v40, 4  ;;  %v538_v23 = vrot.slane %v537_v27, 4  ;;  %v768_v21 = vadd.f32 0.4994258, %v767_v17 }
 0x11b   : > { %v2095_v37 = vadd.f32 1.0, %v729_v55  ;;  %v719_v46 = vadd.f32 1.1283791, %v718_v15  ;;  %v758_v4 = vmul.f32 %v757_v7, %v1864_v45  ;;  %v799_v8 = vadd.f32 1.1283791, %v798_v58 }
 0x11c   : > { %v769_v26 = vmul.f32 %v768_v21, %v1864_v45  ;;  %v546_v2 = vadd.f32 %v545_v31, %v544_v40  ;;  %v2100_v6 = vadd.f32 %v538_v23, %v537_v27  ;;  %v839_v60 = vadd.f32 1.1283791, %v838_v49 }
 0x11d   : > { %1489 = vrcp.f32 %v2095_v37  ;;  %v720_v42 = vmul.f32 %v719_v46, %v1825_v9  ;;  %v694_v36 = vmul.f32 0.5, %v1842_v25  ;;  %v2106_v59 = vadd.f32 1.1283791, %v758_v4 }
 0x11e   : > { %v1486_v51 = vpop.eup %1485  ;;  %v2104_v61 = vadd.f32 1.0, %v769_v26  ;;  %v800_v53 = vmul.f32 %v799_v8, %v1854_v34  ;;  %v822_v50 = vand.u32 2147483648, %v810_v32  ;;  %v820_v63 = vand.u32 2147483647, %v810_v32 }
 0x11f   : > { %v812_v29 = vmul.f32 %v1486_v51, %v810_v32  ;;  %vm817_vm7 = vweird.f32 %v1486_v51  ;;  %v547_v48 = vrot.slane %v546_v2, 2  ;;  %v540_v9 = vrot.slane %v2100_v6, 2 }
 0x120   : > { %v1488_v33 = vpop.eup %1487  ;;  %1491 = vrcp.f32 %v2104_v61  ;;  %v840_v25 = vmul.f32 %v839_v60, %v1883_v54  ;;  %vm816_vm8 = vweird.f32 %v810_v32  ;;  %v862_v41 = vand.u32 2147483648, %v2088_v47 }
 0x121   : > { %v813_v35 = vsub.f32 1.0, %v812_v29  ;;  %v852_v43 = vmul.f32 %v1488_v33, %v2088_v47  ;;  %vm818_vm12 = vmor %vm816_vm8, %vm817_vm7  ;;  %v823_v56 = vor.u32 1.1754944e-38, %v822_v50  ;;  %vm857_vm13 = vweird.f32 %v1488_v33 }
 0x122   : > { %v860_v57 = vand.u32 2147483647, %v2088_v47  ;;  %vm821_vm14 = vcmp.eq.f32.partialorder %v820_v63, 8.507059e+37  ;;  %vm856_vm15 = vweird.f32 %v2088_v47  ;;  %v740_v20 = vand.u32 2147483647, %v2095_v37 }
 0x123   : > { %v814_v45 = vmul.f32 %v1486_v51, %v813_v35  ;;  %v1490_v3 = vpop.eup %1489  ;;  %v853_v22 = vsub.f32 1.0, %v852_v43  ;;  %v742_v44 = vand.u32 2147483648, %v2095_v37  ;;  %vm858_vm1 = vmor %vm856_vm15, %vm857_vm13  ;;  %v863_v11 = vor.u32 1.1754944e-38, %v862_v41 }
 0x124   : > { %v732_v34 = vmul.f32 %v1490_v3, %v2095_v37  ;;  %vm737_vm2 = vweird.f32 %v1490_v3  ;;  %v548_v18 = vadd.f32 %v547_v48, %v546_v2  ;;  %vm861_vm3 = vcmp.eq.f32.partialorder %v860_v57, 8.507059e+37 }
 0x125   : > { %v815_v28 = vadd.f32 %v1486_v51, %v814_v45  ;;  %v854_v38 = vmul.f32 %v1488_v33, %v853_v22  ;;  %vm736_vm4 = vweird.f32 %v2095_v37  ;;  %vm741_vm6 = vcmp.eq.f32.partialorder %v740_v20, 8.507059e+37 }
 0x126   : > { %v733_v5 = vsub.f32 1.0, %v732_v34  ;;  %v1492_v13 = vpop.eup %1491  ;;  %vm738_vm5 = vmor %vm736_vm4, %vm737_vm2  ;;  %v743_v55 = vor.u32 1.1754944e-38, %v742_v44  ;;  %v780_v49 = vand.u32 2147483647, %v2104_v61  ;;  %v782_v31 = vand.u32 2147483648, %v2104_v61 }
 0x127   : > { %v819_v30 = vsel %vm818_vm12, %v1486_v51, %v815_v28  ;;  %v855_v54 = vadd.f32 %v1488_v33, %v854_v38  ;;  %v772_v19 = vmul.f32 %v1492_v13, %v2104_v61  ;;  %vm777_vm9 = vweird.f32 %v1492_v13 }
 0x128   : > { %v824_v10 = vsel %vm821_vm14, %v823_v56, %v819_v30  ;;  %v734_v16 = vmul.f32 %v1490_v3, %v733_v5  ;;  %v695_v8 = vmul.f32 0.5, %v1872_v52  ;;  %vm776_vm10 = vweird.f32 %v2104_v61 }
 0x129   : > { %v825_v32 = vmul.f32 %v824_v10, %v800_v53  ;;  %v859_v0 = vsel %vm858_vm1, %v1488_v33, %v855_v54  ;;  %v773_v17 = vsub.f32 1.0, %v772_v19  ;;  %v541_v26 = vadd.f32 %v540_v9, %v2100_v6  ;;  %vm778_vm11 = vmor %vm776_vm10, %vm777_vm9  ;;  %v1044_v6 = vld [vmem:[%s2236_s5] sm:$0xff]  ;;  %v1045_v9 = vld [vmem:[%s2236_s5 + $0x8] sm:$0xff] }
 0x12a   : > { %v864_v15 = vsel %vm861_vm3, %v863_v11, %v859_v0  ;;  %v735_v27 = vadd.f32 %v1490_v3, %v734_v16  ;;  %v760_v2 = vmul.f32 %v2106_v59, %v1839_v24  ;;  %v783_v33 = vor.u32 1.1754944e-38, %v782_v31 }
 0x12b   : > { %v1388_v40 = vclamps-f32 %v825_v32, 1.0  ;;  %v865_v47 = vmul.f32 %v864_v15, %v840_v25  ;;  %v774_v46 = vmul.f32 %v1492_v13, %v773_v17  ;;  %v549_v35 = vrot.slane %v548_v18, 1 }
 0x12c   : > { %v739_v58 = vsel %vm738_vm5, %v1490_v3, %v735_v27  ;;  %vm781_vm7 = vcmp.eq.f32.partialorder %v780_v49, 8.507059e+37  ;;  %vm1058_vm8 = vcmask 261120   ;;  %v542_v59 = vrot.slane %v541_v26, 1 }
 0x12d   : > { %v1030_v7 = vadd.f32 1.0, %v1388_v40  ;;  %v1389_v23 = vclamps-f32 %v865_v47, 1.0  ;;  %v744_v21 = vsel %vm741_vm6, %v743_v55, %v739_v58  ;;  %v775_v29 = vadd.f32 %v1492_v13, %v774_v46 }
 0x12e   : > { %v745_v4 = vmul.f32 %v744_v21, %v720_v42  ;;  %v692_v42 = vmul.f32 0.5, %v1806_v62  ;;  %v550_v24 = vadd.f32 %v549_v35, %v548_v18  ;;  %v693_v63 = vmul.f32 0.5, %v1830_v14 }
 0x12f   : > { %v1038_v51 = vmul.f32 %v1030_v7, %v694_v36  ;;  %v1031_v37 = vadd.f32 1.0, %v1389_v23  ;;  %v779_v50 = vsel %vm778_vm11, %v1492_v13, %v775_v29  ;;  %v543_v62 = vadd.f32 %v542_v59, %v541_v26 }
 0x130   : > { %v1386_v60 = vclamps-f32 %v745_v4, 1.0  ;;  %v784_v36 = vsel %vm781_vm7, %v783_v33, %v779_v50  ;;  %1493 = vrcp.f32 %v550_v24  ;;  %vm570_vm12 = vweird.f32 %v550_v24 }
 0x131   : > { %1079 = vmatpush.msrb.mxu0 %v1038_v51  ;;  %v1039_v53 = vmul.f32 %v1031_v37, %v695_v8  ;;  %v785_v43 = vmul.f32 %v784_v36, %v760_v2  ;;  %1495 = vrcp.f32 %v543_v62  ;;  %v576_v38 = vand.u32 2147483648, %v550_v24 }
 0x132   : > { %v1028_v52 = vadd.f32 1.0, %v1386_v60  ;;  %v574_v30 = vand.u32 2147483647, %v550_v24  ;;  %vm556_vm15 = vweird.f32 %v543_v62  ;;  %v562_v54 = vand.u32 2147483648, %v543_v62 }
 0x133   : > { %1102 = vmatpush.msrb.mxu1 %v1039_v53  ;;  %v1387_v45 = vclamps-f32 %v785_v43, 1.0  ;;  %v577_v10 = vor.u32 1.1754944e-38, %v576_v38  ;;  %v560_v13 = vand.u32 2147483647, %v543_v62 }
 0x134   : > { %v1036_v61 = vmul.f32 %v1028_v52, %v692_v42  ;;  %vm575_vm2 = vcmp.eq.f32.partialorder %v574_v30, 8.507059e+37  ;;  %v563_v11 = vor.u32 1.1754944e-38, %v562_v54 }
 0x135   : > { %v1029_v3 = vadd.f32 1.0, %v1387_v45  ;;  %vm561_vm4 = vcmp.eq.f32.partialorder %v560_v13, 8.507059e+37 }
 0x136   : > { %1080 = vmatpush.msrb.mxu0 %v1036_v61  ;;  %v1494_v25 = vpop.eup %1493 }
 0x137   : > { %1394 = vmatmul.msk.f32.vlgmr.msrb.gmra.mxu0 %vm1058_vm8, %v1044_v6  ;;  %v1037_v48 = vmul.f32 %v1029_v3, %v693_v63  ;;  %v566_v22 = vmul.f32 %v1494_v25, %v550_v24  ;;  %v1496_v28 = vpop.eup %1495  ;;  %vm571_vm13 = vweird.f32 %v1494_v25 }
 0x138   : > { %v552_v41 = vmul.f32 %v1496_v28, %v543_v62  ;;  %vm572_vm14 = vmor %vm570_vm12, %vm571_vm13  ;;  %vm557_vm1 = vweird.f32 %v1496_v28 }
 0x139   : > { %1103 = vmatpush.msrb.mxu1 %v1037_v48  ;;  %v567_v14 = vsub.f32 1.0, %v566_v22  ;;  %vm558_vm3 = vmor %vm556_vm15, %vm557_vm1 }
 0x13a   : > { %1396 = vmatmul.msk.f32.vlgmr.msrb.gmra.mxu1 %vm1058_vm8, %v1044_v6  ;;  %v553_v56 = vsub.f32 1.0, %v552_v41 }
 0x13b   : > { %v568_v34 = vmul.f32 %v1494_v25, %v567_v14 }
 0x13c   : > { %v554_v5 = vmul.f32 %v1496_v28, %v553_v56 }
 0x13d   : > { %v569_v57 = vadd.f32 %v1494_v25, %v568_v34 }
 0x13e   : > { %v555_v44 = vadd.f32 %v1496_v28, %v554_v5 }
 0x13f   : > { %1395 = vmatmul.msk.f32.gmra.mxu0 %vm1058_vm8, %v1045_v9  ;;  %v573_v20 = vsel %vm572_vm14, %v1494_v25, %v569_v57 }
 0x140   : > { %v578_v32 = vsel %vm575_vm2, %v577_v10, %v573_v20  ;;  %v559_v16 = vsel %vm558_vm3, %v1496_v28, %v555_v44 }
 0x141   : > { %v2141_v18 = vmul.f32 %v578_v32, %v2074_v39  ;;  %v564_v0 = vsel %vm561_vm4, %v563_v11, %v559_v16 }
 0x142   : > { %1397 = vmatmul.msk.f32.gmra.mxu1 %vm1058_vm8, %v1045_v9  ;;  %v2148_v19 = vmul.f32 %v564_v0, %v2080_v12 }
 0x143   : > { %v583_v40 = vrot.slane %v2141_v18, 4 }
 0x145   : > { %v584_v15 = vsel %vm382_vm0, %v2148_v19, %v583_v40 }
 0x146   : > { %586 = vst [vmem:[%s349_s20] sm:$0xff] %v584_v15 }
 0x147   : > { %1536 = shalt.err (!%p1533_p5)
}
 0x148   : > { %1410 = dma.vmem_to_hbm [thread:$0]  (%p1707_p4), %s1236_s25, 128, %s1238_s26, %s1203_s11   ;;  %v1051_v39 = vpop.permute.xlu2 %1050  ;;  %vm1111_vm5 = vcmp.gt.f32.partialorder %v2148_v19, 0.0  ;;  %v1056_v58 = vpop.permute.xlu0 %1055  ;;  %vm1112_vm6 = vcmp.gt.f32.partialorder %v2141_v18, 0.0  ;;  %v1131_v46 = vperm.slane %v2148_v19, 1  ;;  %v1117_v26 = vperm.slane %v2148_v19, 0 }
 0x149   : > { %v1121_v17 = vsel %vm1111_vm5, 1, %v1621_v1  ;;  %v1122_v4 = vsel %vm1112_vm6, 1, %v1621_v1  ;;  %v1132_v53 = vperm.slane %v2141_v18, 1  ;;  %v1153_v24 = vperm.slane %v2148_v19, 2  ;;  %s1216_s2 = scalar_lea.hbm %s2238_s7, %s1407_s22  ;;  %s2259_s3 = sshll.u32 %s2144_s16, 3 }
 0x14a   : > { %v1135_v23 = vperm.slane %v1121_v17, 1  ;;  %v1136_v60 = vperm.slane %v1122_v4, 1  ;;  %v1123_v35 = vperm.slane %v1121_v17, 0  ;;  %v1157_v52 = vperm.slane %v1121_v17, 2  ;;  %s342_s19 = scalar_lea.vmem [#allocation2], %s2259_s3  ;;  %s1220_s23 = sshll.u32 %s1216_s2, 4  ;;  %s1221_s23 = int_to_ptr.hbm [resolvable:$true] %s1220_s23 }
 0x14b   : > { %v1169_v1 = vperm.slane %v1121_v17, 3  ;;  %v1165_v59 = vperm.slane %v2148_v19, 3  ;;  %v1118_v63 = vperm.slane %v2141_v18, 0  ;;  %v1124_v3 = vperm.slane %v1122_v4, 0  ;;  %s1218_s20 = sshll.u32 %s342_s19, 4  ;;  %s1198_s30 = scalar_lea.sflag [#allocation3], %s2144_s16  ;;  %s1219_s20 = int_to_ptr.vmem [resolvable:$true] %s1218_s20 }
 0x14c   : > { %vm1137_vm9 = vcmp.eq.s32.totalorder %v1135_v23, 1  ;;  %vm2179_vm10 = vcmp.eq.s32.totalorder %v1136_v60, 1  ;;  %vm1125_vm11 = vcmp.eq.s32.totalorder %v1123_v35, 1  ;;  %vm1159_vm7 = vcmp.eq.s32.totalorder %v1157_v52, 1  ;;  %s1551_s24 = sshra.s32 %s1221_s23, 4  ;;  %s1557_s26 = scalar_lea.hbm %s2238_s7, 16  ;;  %s1552_s24 = int_to_ptr.hbm [resolvable:$true] %s1551_s24 }
 0x14d   : > { %vm1171_vm8 = vcmp.eq.s32.totalorder %v1169_v1, 1  ;;  %v1158_v14 = vperm.slane %v1122_v4, 2  ;;  %v1170_v38 = vperm.slane %v1122_v4, 3  ;;  %v1154_v5 = vperm.slane %v2141_v18, 2  ;;  %s1553_s21 = scalar_lea.hbm %s1552_s24, 8  ;;  %p1558_p10 = scmp.lt.s32.totalorder %s1552_s24, %s2238_s7 }
 0x14e   : > { %v1166_v10 = vperm.slane %v2141_v18, 3  ;;  %vm1126_vm12 = vcmp.eq.s32.totalorder %v1124_v3, 1  ;;  %p1554_p6 = scmp.ne.s32.totalorder %s1552_s24, %s1553_s21  ;;  %p1559_p11 = scmp.lt.s32.totalorder %s1557_s26, %s1553_s21 }
 0x14f   : > { %vm1160_vm13 = vcmp.eq.s32.totalorder %v1158_v14, 1  ;;  %vm1172_vm14 = vcmp.eq.s32.totalorder %v1170_v38, 1 }
 0x150   : > { %p1555_p7 = pnand %p1554_p6, %p1707_p4  ;;  %p1560_p12 = por %p1559_p11, %p1558_p10 }
 0x152   : > { %p1556_p9 = pneg %p1555_p7 }
 0x154   : > { %p1561_p13 = pnand %p1560_p12, %p1556_p9 }
 0x1b4   : > { %v1082_v12 = vpop.f32.mrf.mxu0 }
 0x1b5   : > { %v1083_v27 = vadd.f32 %v1082_v12, %v1051_v39 }
 0x1b7   : > { %v1113_v47 = vmul.f32 1.442695, %v1083_v27  ;;  %v1105_v55 = vpop.f32.mrf.mxu1 }
 0x1b8   : > { %v1106_v7 = vadd.f32 %v1105_v55, %v1051_v39 }
 0x1b9   : > { %1497 = vpow2.f32 %v1113_v47 }
 0x1ba   : > { %v1115_v49 = vmul.f32 1.442695, %v1106_v7 }
 0x1bc   : > { %v1085_v31 = vpop.f32.mrf.mxu0  ;;  %1499 = vpow2.f32 %v1115_v49 }
 0x1bd   : > { %v1086_v21 = vadd.f32 %v1085_v31, %v1056_v58 }
 0x1bf   : > { %v1498_v51 = vpop.eup %1497  ;;  %v1149_v8 = vmul.f32 1.442695, %v1086_v21  ;;  %v1108_v29 = vpop.f32.mrf.mxu1 }
 0x1c0   : > { %v1133_v37 = vmul.f32 %v1498_v51, %v1131_v46  ;;  %v1109_v33 = vadd.f32 %v1108_v29, %v1056_v58  ;;  %v1119_v42 = vmul.f32 %v1498_v51, %v1117_v26 }
 0x1c1   : > { %1501 = vpow2.f32 %v1149_v8 }
 0x1c2   : > { %v1139_v2 = vsel %vm1137_vm9, %v1133_v37, 0.0  ;;  %v1500_v50 = vpop.eup %1499  ;;  %v1151_v36 = vmul.f32 1.442695, %v1109_v33  ;;  %v1127_v48 = vsel %vm1125_vm11, %v1119_v42, 0.0 }
 0x1c3   : > { %v1143_v43 = vrot.slane %v1139_v2, 4  ;;  %v1134_v61 = vmul.f32 %v1500_v50, %v1132_v53  ;;  %v1120_v28 = vmul.f32 %v1500_v50, %v1118_v63 }
 0x1c4   : > { %1503 = vpow2.f32 %v1151_v36 }
 0x1c5   : > { %v1140_v62 = vsel %vm2179_vm10, %v1134_v61, 0.0  ;;  %v1147_v22 = vadd.f32 %v1143_v43, %v1127_v48  ;;  %v1128_v20 = vsel %vm1126_vm12, %v1120_v28, 0.0 }
 0x1c6   : > { %v1144_v41 = vrot.slane %v1140_v62, 4 }
 0x1c7   : > { %v1502_v45 = vpop.eup %1501 }
 0x1c8   : > { %v1155_v9 = vmul.f32 %v1502_v45, %v1153_v24  ;;  %v1167_v25 = vmul.f32 %v1502_v45, %v1165_v59  ;;  %v1148_v11 = vadd.f32 %v1144_v41, %v1128_v20 }
 0x1ca   : > { %v1161_v34 = vsel %vm1159_vm7, %v1155_v9, 0.0  ;;  %v1173_v56 = vsel %vm1171_vm8, %v1167_v25, 0.0  ;;  %v1504_v54 = vpop.eup %1503 }
 0x1cb   : > { %v1163_v57 = vadd.f32 %v1161_v34, %v1147_v22  ;;  %v1177_v30 = vrot.slane %v1173_v56, 4  ;;  %v1156_v13 = vmul.f32 %v1504_v54, %v1154_v5  ;;  %v1168_v32 = vmul.f32 %v1504_v54, %v1166_v10 }
 0x1cd   : > { %v1181_v44 = vadd.f32 %v1177_v30, %v1163_v57  ;;  %v1162_v16 = vsel %vm1160_vm13, %v1156_v13, 0.0  ;;  %v1174_v0 = vsel %vm1172_vm14, %v1168_v32, 0.0 }
 0x1ce   : > { %v1164_v19 = vadd.f32 %v1162_v16, %v1148_v11  ;;  %v1178_v40 = vrot.slane %v1174_v0, 4 }
 0x1cf   : > { %vm1183_vm15 = vcmp.eq.f32.partialorder %v1181_v44, 0.0 }
 0x1d0   : > { %v1182_v15 = vadd.f32 %v1178_v40, %v1164_v19  ;;  %v1185_v39 = vsel %vm1183_vm15, 2.220446e-16, %v1181_v44 }
 0x1d1   : > { %1505 = vlog2.f32 %v1185_v39 }
 0x1d2   : > { %vm1184_vm1 = vcmp.eq.f32.partialorder %v1182_v15, 0.0 }
 0x1d3   : > { %v1186_v18 = vsel %vm1184_vm1, 2.220446e-16, %v1182_v15 }
 0x1d4   : > { %1507 = vlog2.f32 %v1186_v18 }
 0x1d7   : > { %v1506_v12 = vpop.eup %1505 }
 0x1d8   : > { %v1188_v55 = vmul.f32 0.6931472, %v1506_v12 }
 0x1da   : > { %v1508_v27 = vpop.eup %1507 }
 0x1db   : > { %v1190_v47 = vmul.f32 0.6931472, %v1508_v27 }
 0x1dd   : > { %v1193_v17 = vrot.slane %v1190_v47, 4 }
 0x1df   : > { %v1194_v7 = vsel %vm382_vm0, %v1188_v55, %v1193_v17 }
 0x1e0   : > { %1196 = vst [vmem:[%s342_s19] sm:$0xff] %v1194_v7 }
 0x1e1   : > { %1564 = shalt.err (!%p1561_p13)
}
 0x1e2   : > { %1409 = dma.vmem_to_hbm [thread:$0]  (%p1707_p4), %s1219_s20, 128, %s1221_s23, %s1198_s30  }
 0x1e3 PF: > { %p1420_p0 = scmp.ge.s32.totalorder %s1619_s10, 2  ;;  %s1249_s16 = sand.u32 1, %s1599_s27  }
 0x1e4   : > { %s1250_s14 = scalar_lea.sflag [#allocation3], %s1249_s16 }
 0x1e5   : > { %p1414_p1 = pnand %p1420_p0, %p1714_p8 }
 0x1e7   : > { %p1415_p2 = pneg %p1414_p1 }
 0x1e9   : > { %1590 = dma.done.wait (%p1415_p2), %s1250_s14, 128  }
 0x1ea   : > { %1592 = vsyncadd (%p1415_p2), %s1250_s14, 4294967168  ;;  %s1260_s0 = scalar_lea.sflag [#allocation5], %s1249_s16 }
 0x1eb   : > { %1594 = dma.done.wait (%p1415_p2), %s1260_s0, 128  }
 0x1ec   : > { %1596 = vsyncadd (%p1415_p2), %s1260_s0, 4294967168  ;;  %s25_s10 = sadd.s32 1, %s1619_s10   ;;  %s2260_s27 = smov %s1603_s28 }
 0x1ed   : > { %p22_p3 = scmp.ge.s32.totalorder %s25_s10, 4   ;;  %s2261_s28 = smov %s1607_s29 }
 0x1ee   : > { %s2262_s29 = smov %s1720_s18  ;;  %s2263_s30 = smov %s1615_s9 }
 0x1ef   : > { %s2264_s9 = smov %s2266_s13  ;;  %24 = sbr.rel (!%p22_p3) target bundleno = 11 (0xb), region = 103 }
 0x1f4   :  { %1266 = vsyncpa [#allocation3], 1 }
 0x1f5   :  { %1268 = vsyncpa [#allocation3 + $0x1], 1 }
 0x1f6   :  { %1269 = vsyncpa [#allocation5], 1 }
 0x1f7   :  { %1271 = vsyncpa [#allocation5 + $0x1], 1 }

</bundles_post_ra>
